<compile_context>
chip_gen: v7x
topology: tpu7x:2x2x1
jax: 0.10.0
libtpu: 0.0.40
codegen_flags: <defaults>
</compile_context>

<pallas_src>
import functools
import math

import jax
import jax.numpy as jnp
from jax import lax
from jax.experimental import pallas as pl
from jax.experimental.pallas import tpu as pltpu


# ----------------------------- Pallas kernel --------------------------------
def _swa_kernel(num_heads,
                x_ref, wqkv_ref, bqkv_ref, wo_ref, bo_ref, bias_ref, o_ref):
    """Windowed MHA over one slab of T row-major image tokens.

    x_ref:    (T, C)            raw tokens (input dtype; cast to bf16 in-kernel)
    wqkv_ref: (C, 3C)           fused Q|K|V weights, "x @ W" form, Q pre-scaled
    bqkv_ref: (1, 3C)           fused Q|K|V bias (fp32, Q bias pre-scaled)
    wo_ref:   (C, C)            output projection weight, "x @ W" form
    bo_ref:   (1, C)            output projection bias (fp32)
    bias_ref: (heads, T, T)     relative-position bias + block-diagonal window
                                mask (-1e9 on cross-window pairs), fp32
    o_ref:    (T, C)            output tokens
    """
    T, C = x_ref.shape
    hd = C // num_heads
    cdt = wqkv_ref.dtype                     # compute dtype (bf16)

    # Cast activations to the compute dtype in-kernel (saves a wrapper HBM pass).
    x = x_ref[...].astype(cdt)               # (T, C)

    # Fused QKV projection: one wide MXU matmul with a T=128 M dimension,
    # fp32 accumulation + fp32 bias, then a SINGLE downcast of the whole qkv.
    qkv = jnp.dot(x, wqkv_ref[...], preferred_element_type=jnp.float32)
    qkv = (qkv + bqkv_ref[...]).astype(cdt)  # (T, 3C) bf16

    heads_out = []
    for h in range(num_heads):               # small static unroll; per head the
        qh = qkv[:, h * hd:(h + 1) * hd]     # score matmul is a full dense
        kh = qkv[:, C + h * hd:C + (h + 1) * hd]        # (T, T)=(128,128) tile.
        vh = qkv[:, 2 * C + h * hd:2 * C + (h + 1) * hd]

        # Dense NT score matmul over the whole slab; cross-window pairs are
        # killed by the -1e9 entries baked into bias_ref, so one lane-dense
        # softmax per head reproduces per-window attention exactly.
        s = lax.dot_general(qh, kh, (((1,), (1,)), ((), ())),
                            preferred_element_type=jnp.float32)   # (T, T) fp32
        s = s + bias_ref[h]
        s = s - jnp.max(s, axis=-1, keepdims=True)                # 128-wide reduce
        p = jnp.exp(s)                                            # exp(-1e9-m) -> 0
        p = p * pl.reciprocal(jnp.sum(p, axis=-1, keepdims=True), approx=True)

        heads_out.append(jnp.dot(p.astype(cdt), vh,
                                 preferred_element_type=jnp.float32))  # (T, hd)

    # Assemble all heads once, then a single (T,C)@(C,C) output projection
    # (no per-head K=hd matmuls, no long-lived fp32 accumulator).
    attn = jnp.concatenate(heads_out, axis=-1).astype(cdt)        # (T, C)
    out = jnp.dot(attn, wo_ref[...], preferred_element_type=jnp.float32)
    out = out + bo_ref[...]
    # NOTE: with C < 128 this store is lane-masked; for real Swin dims (C>=96)
    # it is (nearly) lane-dense, and the wrapper-pass elimination dominates.
    o_ref[...] = out.astype(o_ref.dtype)


# ------------------------------ glue (plain JAX) -----------------------------
def window_partition(x, ws):
    """Used only by the pure-JAX reference (the kernel path never materializes
    window-partitioned activations)."""
    B, H, W, C = x.shape
    Hp = -(-H // ws) * ws
    Wp = -(-W // ws) * ws
    x = jnp.pad(x, ((0, 0), (0, Hp - H), (0, Wp - W), (0, 0)))
    x = x.reshape(B, Hp // ws, ws, Wp // ws, ws, C)
    x = x.transpose(0, 1, 3, 2, 4, 5).reshape(-1, ws, ws, C)
    return x


def window_reverse(windows, ws, B, H, W):
    """Used only by the pure-JAX reference."""
    Hp = -(-H // ws) * ws
    Wp = -(-W // ws) * ws
    C = windows.shape[-1]
    x = windows.reshape(B, Hp // ws, Wp // ws, ws, ws, C)
    x = x.transpose(0, 1, 3, 2, 4, 5).reshape(B, Hp, Wp, C)
    return x[:, :H, :W, :]


def relative_position_index(ws):
    coords = jnp.stack(jnp.meshgrid(jnp.arange(ws), jnp.arange(ws),
                                    indexing="ij")).reshape(2, -1)
    rel = coords[:, :, None] - coords[:, None, :]
    rel = jnp.transpose(rel, (1, 2, 0)) + (ws - 1)
    rel = rel.at[:, :, 0].multiply(2 * ws - 1)
    return rel.sum(-1)  # (ws*ws, ws*ws)


def _relative_bias(params, ws, num_heads):
    L = ws * ws
    idx = relative_position_index(ws).reshape(-1)
    bias = params["rel_table"][idx].reshape(L, L, num_heads)
    return bias.transpose(2, 0, 1)  # (num_heads, L, L)


def _block_relative_bias(rel_bias, ws, Wp, rows, neg=-1e9):
    """Expand the per-window (heads, L, L) bias to a dense (heads, T, T) bias
    for a slab of `rows` x `Wp` row-major image tokens.  Same-window pairs get
    the relative-position bias, cross-window pairs get -1e9, so a single dense
    softmax over the T axis is exactly per-window attention."""
    T = rows * Wp
    r = jnp.arange(rows)[:, None]                      # (rows, 1)
    c = jnp.arange(Wp)[None, :]                        # (1, Wp)
    win = ((r // ws) * (Wp // ws) + (c // ws)).reshape(T)      # window id per token
    lpos = ((r % ws) * ws + (c % ws)).reshape(T)               # pos within window
    same = win[:, None] == win[None, :]                        # (T, T)
    bias = rel_bias[:, lpos[:, None], lpos[None, :]]           # (heads, T, T)
    return jnp.where(same[None], bias, neg).astype(jnp.float32)


def _pick_rows_per_block(B, Hp, Wp, ws, target_tokens=128, min_steps=4):
    """Pick RB = window-rows per grid step.  RB*ws must divide Hp (blocks never
    straddle a window row or an image).  Prefer slabs with T = RB*ws*Wp >=
    target_tokens (lane-dense 128-wide scores / softmax) while keeping
    >= min_steps grid steps so v7x's two TensorCores each get several steps;
    on single-TC v5e/v6e the extra steps only cost ~0.35 us each."""
    n_wrows = Hp // ws
    divisors = [d for d in range(1, n_wrows + 1) if n_wrows % d == 0]
    good = [d for d in divisors if B * (n_wrows // d) >= min_steps] or divisors
    for d in good:                         # ascending: smallest RB meeting target
        if d * ws * Wp >= target_tokens:
            return d
    return good[-1]


def shifted_window_attention(x, params, *, window_size, num_heads, shift_size,
                             compute_dtype=jnp.bfloat16):
    B, H, W, C = x.shape
    ws = window_size
    hd = C // num_heads
    scale = 1.0 / math.sqrt(hd)

    # TODO(synk): like the reference PyTorch module, no cross-region attention
    # mask is applied for shift_size > 0 (the module only adds the relative
    # position bias as attn_mask), and zero-padded edge tokens (H or W not a
    # multiple of ws) participate unmasked, matching the spec module.
    if shift_size > 0:
        x = jnp.roll(x, shift=(-shift_size, -shift_size), axis=(1, 2))

    Hp = -(-H // ws) * ws
    Wp = -(-W // ws) * ws
    if Hp != H or Wp != W:
        x = jnp.pad(x, ((0, 0), (0, Hp - H), (0, Wp - W), (0, 0)))

    # Slab geometry: T consecutive row-major tokens = RB whole window-rows.
    RB = _pick_rows_per_block(B, Hp, Wp, ws)
    rows = RB * ws
    T = rows * Wp

    rel_bias = _relative_bias(params, ws, num_heads).astype(jnp.float32)
    blk_bias = _block_relative_bias(rel_bias, ws, Wp, rows)     # (heads, T, T)

    # Fuse QKV into one (C, 3C) weight in "x @ W" form; fold the 1/sqrt(hd)
    # scale into the Q columns/bias once here instead of per token in-kernel.
    wqkv_t = jnp.concatenate(
        [(params["wq"] * scale).T, params["wk"].T, params["wv"].T], axis=1
    ).astype(compute_dtype)                                     # (C, 3C)
    bqkv = jnp.concatenate(
        [params["bq"] * scale, params["bk"], params["bv"]]
    ).reshape(1, 3 * C).astype(jnp.float32)
    wo_t = params["wo"].T.astype(compute_dtype)                 # (C, C)
    bo = params["bo"].reshape(1, C).astype(jnp.float32)

    # Free reshape: row-major token stream.  Window partitioning lives entirely
    # in the block-diagonal bias, so no partition/transpose HBM passes.
    tokens = x.reshape(B * Hp * Wp, C)
    grid = (tokens.shape[0] // T,)

    kernel = functools.partial(_swa_kernel, num_heads)
    out_tokens = pl.pallas_call(
        kernel,
        out_shape=jax.ShapeDtypeStruct(tokens.shape, x.dtype),
        grid_spec=pltpu.PrefetchScalarGridSpec(
            num_scalar_prefetch=0,
            grid=grid,
            in_specs=[
                pl.BlockSpec((T, C), lambda i: (i, 0)),                # tokens
                pl.BlockSpec((C, 3 * C), lambda i: (0, 0)),            # wqkv^T
                pl.BlockSpec((1, 3 * C), lambda i: (0, 0)),            # bqkv
                pl.BlockSpec((C, C), lambda i: (0, 0)),                # wo^T
                pl.BlockSpec((1, C), lambda i: (0, 0)),                # bo
                pl.BlockSpec((num_heads, T, T), lambda i: (0, 0, 0)),  # bias+mask
            ],
            out_specs=pl.BlockSpec((T, C), lambda i: (i, 0)),
        ),
        # Blocks are small here (bias is the largest at heads*T*T fp32, 256 KiB
        # double-buffered), well under the default scoped VMEM on all chips.
        compiler_params=pltpu.CompilerParams(dimension_semantics=("parallel",)),
    )(tokens, wqkv_t, bqkv, wo_t, bo, blk_bias)

    out = out_tokens.reshape(B, Hp, Wp, C)[:, :H, :W, :]
    if shift_size > 0:
        out = jnp.roll(out, shift=(shift_size, shift_size), axis=(1, 2))
    return out


# --------------------------- pure-JAX reference ------------------------------
def reference_forward(x, params, *, window_size, num_heads, shift_size):
    B, H, W, C = x.shape
    ws = window_size
    L = ws * ws
    hd = C // num_heads
    scale = 1.0 / float(hd) ** 0.5

    if shift_size > 0:
        x = jnp.roll(x, shift=(-shift_size, -shift_size), axis=(1, 2))
    windows = window_partition(x, ws).reshape(-1, L, C)
    nwin = windows.shape[0]

    rel_bias = _relative_bias(params, ws, num_heads)

    q = windows @ params["wq"].T + params["bq"]
    k = windows @ params["wk"].T + params["bk"]
    v = windows @ params["wv"].T + params["bv"]
    q = q.reshape(nwin, L, num_heads, hd).transpose(0, 2, 1, 3)
    k = k.reshape(nwin, L, num_heads, hd).transpose(0, 2, 1, 3)
    v = v.reshape(nwin, L, num_heads, hd).transpose(0, 2, 1, 3)
    s = jnp.einsum("whld,whmd->whlm", q, k) * scale + rel_bias[None]
    p = jax.nn.softmax(s, axis=-1)
    o = jnp.einsum("whlm,whmd->whld", p, v).transpose(0, 2, 1, 3).reshape(nwin, L, C)
    o = o @ params["wo"].T + params["bo"]

    o = o.reshape(-1, ws, ws, C)
    out = window_reverse(o, ws, B, H, W)
    if shift_size > 0:
        out = jnp.roll(out, shift=(shift_size, shift_size), axis=(1, 2))
    return out


# ---------------------------------- main -------------------------------------
if __name__ == "__main__":
    embed_dim, window_size, num_heads, shift_size = 32, 4, 4, 2
    B, H, W = 2, 16, 16

    key = jax.random.PRNGKey(0)
    keys = jax.random.split(key, 6)
    x = jax.random.normal(keys[0], (B, H, W, embed_dim), jnp.float32)

    # nn.MultiheadAttention params (in_proj: (3E, E) / (3E,), out_proj: (E, E)/(E,))
    in_proj_w = jax.random.normal(keys[1], (3 * embed_dim, embed_dim), jnp.float32) * 0.1
    in_proj_b = jax.random.normal(keys[2], (3 * embed_dim,), jnp.float32) * 0.1
    out_proj_w = jax.random.normal(keys[3], (embed_dim, embed_dim), jnp.float32) * 0.1
    out_proj_b = jax.random.normal(keys[4], (embed_dim,), jnp.float32) * 0.1
    # PyTorch inits the bias table to zeros; use small deterministic random
    # values here so the relative-position-bias path is actually exercised.
    rel_table = jax.random.normal(
        keys[5], ((2 * window_size - 1) ** 2, num_heads), jnp.float32) * 0.1

    params = dict(
        wq=in_proj_w[:embed_dim],
        wk=in_proj_w[embed_dim:2 * embed_dim],
        wv=in_proj_w[2 * embed_dim:],
        bq=in_proj_b[:embed_dim],
        bk=in_proj_b[embed_dim:2 * embed_dim],
        bv=in_proj_b[2 * embed_dim:],
        wo=out_proj_w,
        bo=out_proj_b,
        rel_table=rel_table,
    )

    out = shifted_window_attention(x, params, window_size=window_size,
                                   num_heads=num_heads, shift_size=shift_size)
    out = jax.block_until_ready(out)

    ref = reference_forward(x, params, window_size=window_size,
                            num_heads=num_heads, shift_size=shift_size)
    assert out.shape == (B, H, W, embed_dim), out.shape
    # bf16 matmul operands (fp32 accumulation + fp32 softmax) vs fp32 reference.
    max_err = float(jnp.max(jnp.abs(out - ref)))
    assert jnp.allclose(out, ref, atol=3e-2, rtol=3e-2), max_err
    print("KERNEL_OK")
</pallas_src>

<mosaic_0001>
module attributes {stable_mosaic.version = 11 : i64} {
  func.func @_swa_kernel(%arg0: i32, %arg1: memref<128x32xf32, #tpu.memory_space<vmem>>, %arg2: memref<32x96xbf16, #tpu.memory_space<vmem>>, %arg3: memref<1x96xf32, #tpu.memory_space<vmem>>, %arg4: memref<32x32xbf16, #tpu.memory_space<vmem>>, %arg5: memref<1x32xf32, #tpu.memory_space<vmem>>, %arg6: memref<4x128x128xf32, #tpu.memory_space<vmem>>, %arg7: memref<128x32xf32, #tpu.memory_space<vmem>>) attributes {dimension_semantics = [#tpu.dimension_semantics<parallel>], iteration_bounds = array<i64: 4>, scalar_prefetch = 0 : i64, scratch_operands = 0 : i64, tpu.core_type = #tpu.core_type<tc>, window_params = [{transform_indices = @transform_0, window_bounds = array<i64: 128, 32>}, {pipeline_mode = #tpu.pipeline_mode<synchronous>, transform_indices = @transform_1, window_bounds = array<i64: 32, 96>}, {pipeline_mode = #tpu.pipeline_mode<synchronous>, transform_indices = @transform_2, window_bounds = array<i64: 1, 96>}, {pipeline_mode = #tpu.pipeline_mode<synchronous>, transform_indices = @transform_3, window_bounds = array<i64: 32, 32>}, {pipeline_mode = #tpu.pipeline_mode<synchronous>, transform_indices = @transform_4, window_bounds = array<i64: 1, 32>}, {pipeline_mode = #tpu.pipeline_mode<synchronous>, transform_indices = @transform_5, window_bounds = array<i64: 4, 128, 128>}, {transform_indices = @transform_6, window_bounds = array<i64: 128, 32>}]} {
    %c0 = arith.constant 0 : index
    %c0_0 = arith.constant 0 : index
    %0 = vector.load %arg1[%c0, %c0_0] : memref<128x32xf32, #tpu.memory_space<vmem>>, vector<128x32xf32>
    %1 = arith.truncf %0 : vector<128x32xf32> to vector<128x32xbf16>
    %c0_1 = arith.constant 0 : index
    %c0_2 = arith.constant 0 : index
    %2 = vector.load %arg2[%c0_1, %c0_2] : memref<32x96xbf16, #tpu.memory_space<vmem>>, vector<32x96xbf16>
    %cst = arith.constant dense<0.000000e+00> : vector<128x96xf32>
    %3 = tpu.matmul %1, %2, %cst {dimension_numbers = #tpu.dot_dimension_numbers<[1], [0], [0], [1], [0, 0, 1, 1], [], []>} : vector<128x32xbf16>, vector<32x96xbf16>, vector<128x96xf32> -> vector<128x96xf32>
    %c0_3 = arith.constant 0 : index
    %c0_4 = arith.constant 0 : index
    %4 = vector.load %arg3[%c0_3, %c0_4] : memref<1x96xf32, #tpu.memory_space<vmem>>, vector<1x96xf32>
    %5 = vector.broadcast %4 : vector<1x96xf32> to vector<128x96xf32>
    %6 = arith.addf %3, %5 : vector<128x96xf32>
    %7 = arith.truncf %6 : vector<128x96xf32> to vector<128x96xbf16>
    %8 = vector.extract_strided_slice %7 {offsets = [0, 0], sizes = [128, 8], strides = [1, 1]} : vector<128x96xbf16> to vector<128x8xbf16>
    %9 = vector.extract_strided_slice %7 {offsets = [0, 32], sizes = [128, 8], strides = [1, 1]} : vector<128x96xbf16> to vector<128x8xbf16>
    %10 = vector.extract_strided_slice %7 {offsets = [0, 64], sizes = [128, 8], strides = [1, 1]} : vector<128x96xbf16> to vector<128x8xbf16>
    %cst_5 = arith.constant dense<0.000000e+00> : vector<128x128xf32>
    %11 = tpu.matmul %8, %9, %cst_5 {dimension_numbers = #tpu.dot_dimension_numbers<[1], [1], [0], [0], [0, 0, 1, 0], [], []>} : vector<128x8xbf16>, vector<128x8xbf16>, vector<128x128xf32> -> vector<128x128xf32>
    %c0_6 = arith.constant 0 : index
    %c0_7 = arith.constant 0 : index
    %c0_8 = arith.constant 0 : index
    %12 = vector.load %arg6[%c0_6, %c0_7, %c0_8] : memref<4x128x128xf32, #tpu.memory_space<vmem>>, vector<1x128x128xf32>
    %13 = vector.shape_cast %12 : vector<1x128x128xf32> to vector<128x128xf32>
    %14 = arith.addf %11, %13 : vector<128x128xf32>
    %cst_9 = arith.constant dense<0xFF800000> : vector<128xf32>
    %15 = vector.multi_reduction <maximumf>, %14, %cst_9 [1] : vector<128x128xf32> to vector<128xf32>
    %16 = vector.shape_cast %15 : vector<128xf32> to vector<128x1xf32>
    %17 = vector.broadcast %16 : vector<128x1xf32> to vector<128x128xf32>
    %18 = arith.subf %14, %17 : vector<128x128xf32>
    %19 = math.exp %18 : vector<128x128xf32>
    %cst_10 = arith.constant dense<0.000000e+00> : vector<128xf32>
    %20 = vector.multi_reduction <add>, %19, %cst_10 [1] : vector<128x128xf32> to vector<128xf32>
    %21 = vector.shape_cast %20 : vector<128xf32> to vector<128x1xf32>
    %22 = tpu.reciprocal %21 {approx = true} : vector<128x1xf32> -> vector<128x1xf32>
    %23 = vector.broadcast %22 : vector<128x1xf32> to vector<128x128xf32>
    %24 = arith.mulf %19, %23 : vector<128x128xf32>
    %25 = arith.truncf %24 : vector<128x128xf32> to vector<128x128xbf16>
    %cst_11 = arith.constant dense<0.000000e+00> : vector<128x8xf32>
    %26 = tpu.matmul %25, %10, %cst_11 {dimension_numbers = #tpu.dot_dimension_numbers<[1], [0], [0], [1], [0, 0, 1, 1], [], []>} : vector<128x128xbf16>, vector<128x8xbf16>, vector<128x8xf32> -> vector<128x8xf32>
    %27 = vector.extract_strided_slice %7 {offsets = [0, 8], sizes = [128, 8], strides = [1, 1]} : vector<128x96xbf16> to vector<128x8xbf16>
    %28 = vector.extract_strided_slice %7 {offsets = [0, 40], sizes = [128, 8], strides = [1, 1]} : vector<128x96xbf16> to vector<128x8xbf16>
    %29 = vector.extract_strided_slice %7 {offsets = [0, 72], sizes = [128, 8], strides = [1, 1]} : vector<128x96xbf16> to vector<128x8xbf16>
    %cst_12 = arith.constant dense<0.000000e+00> : vector<128x128xf32>
    %30 = tpu.matmul %27, %28, %cst_12 {dimension_numbers = #tpu.dot_dimension_numbers<[1], [1], [0], [0], [0, 0, 1, 0], [], []>} : vector<128x8xbf16>, vector<128x8xbf16>, vector<128x128xf32> -> vector<128x128xf32>
    %c1 = arith.constant 1 : index
    %c0_13 = arith.constant 0 : index
    %c0_14 = arith.constant 0 : index
    %31 = vector.load %arg6[%c1, %c0_13, %c0_14] : memref<4x128x128xf32, #tpu.memory_space<vmem>>, vector<1x128x128xf32>
    %32 = vector.shape_cast %31 : vector<1x128x128xf32> to vector<128x128xf32>
    %33 = arith.addf %30, %32 : vector<128x128xf32>
    %cst_15 = arith.constant dense<0xFF800000> : vector<128xf32>
    %34 = vector.multi_reduction <maximumf>, %33, %cst_15 [1] : vector<128x128xf32> to vector<128xf32>
    %35 = vector.shape_cast %34 : vector<128xf32> to vector<128x1xf32>
    %36 = vector.broadcast %35 : vector<128x1xf32> to vector<128x128xf32>
    %37 = arith.subf %33, %36 : vector<128x128xf32>
    %38 = math.exp %37 : vector<128x128xf32>
    %cst_16 = arith.constant dense<0.000000e+00> : vector<128xf32>
    %39 = vector.multi_reduction <add>, %38, %cst_16 [1] : vector<128x128xf32> to vector<128xf32>
    %40 = vector.shape_cast %39 : vector<128xf32> to vector<128x1xf32>
    %41 = tpu.reciprocal %40 {approx = true} : vector<128x1xf32> -> vector<128x1xf32>
    %42 = vector.broadcast %41 : vector<128x1xf32> to vector<128x128xf32>
    %43 = arith.mulf %38, %42 : vector<128x128xf32>
    %44 = arith.truncf %43 : vector<128x128xf32> to vector<128x128xbf16>
    %cst_17 = arith.constant dense<0.000000e+00> : vector<128x8xf32>
    %45 = tpu.matmul %44, %29, %cst_17 {dimension_numbers = #tpu.dot_dimension_numbers<[1], [0], [0], [1], [0, 0, 1, 1], [], []>} : vector<128x128xbf16>, vector<128x8xbf16>, vector<128x8xf32> -> vector<128x8xf32>
    %46 = vector.extract_strided_slice %7 {offsets = [0, 16], sizes = [128, 8], strides = [1, 1]} : vector<128x96xbf16> to vector<128x8xbf16>
    %47 = vector.extract_strided_slice %7 {offsets = [0, 48], sizes = [128, 8], strides = [1, 1]} : vector<128x96xbf16> to vector<128x8xbf16>
    %48 = vector.extract_strided_slice %7 {offsets = [0, 80], sizes = [128, 8], strides = [1, 1]} : vector<128x96xbf16> to vector<128x8xbf16>
    %cst_18 = arith.constant dense<0.000000e+00> : vector<128x128xf32>
    %49 = tpu.matmul %46, %47, %cst_18 {dimension_numbers = #tpu.dot_dimension_numbers<[1], [1], [0], [0], [0, 0, 1, 0], [], []>} : vector<128x8xbf16>, vector<128x8xbf16>, vector<128x128xf32> -> vector<128x128xf32>
    %c2 = arith.constant 2 : index
    %c0_19 = arith.constant 0 : index
    %c0_20 = arith.constant 0 : index
    %50 = vector.load %arg6[%c2, %c0_19, %c0_20] : memref<4x128x128xf32, #tpu.memory_space<vmem>>, vector<1x128x128xf32>
    %51 = vector.shape_cast %50 : vector<1x128x128xf32> to vector<128x128xf32>
    %52 = arith.addf %49, %51 : vector<128x128xf32>
    %cst_21 = arith.constant dense<0xFF800000> : vector<128xf32>
    %53 = vector.multi_reduction <maximumf>, %52, %cst_21 [1] : vector<128x128xf32> to vector<128xf32>
    %54 = vector.shape_cast %53 : vector<128xf32> to vector<128x1xf32>
    %55 = vector.broadcast %54 : vector<128x1xf32> to vector<128x128xf32>
    %56 = arith.subf %52, %55 : vector<128x128xf32>
    %57 = math.exp %56 : vector<128x128xf32>
    %cst_22 = arith.constant dense<0.000000e+00> : vector<128xf32>
    %58 = vector.multi_reduction <add>, %57, %cst_22 [1] : vector<128x128xf32> to vector<128xf32>
    %59 = vector.shape_cast %58 : vector<128xf32> to vector<128x1xf32>
    %60 = tpu.reciprocal %59 {approx = true} : vector<128x1xf32> -> vector<128x1xf32>
    %61 = vector.broadcast %60 : vector<128x1xf32> to vector<128x128xf32>
    %62 = arith.mulf %57, %61 : vector<128x128xf32>
    %63 = arith.truncf %62 : vector<128x128xf32> to vector<128x128xbf16>
    %cst_23 = arith.constant dense<0.000000e+00> : vector<128x8xf32>
    %64 = tpu.matmul %63, %48, %cst_23 {dimension_numbers = #tpu.dot_dimension_numbers<[1], [0], [0], [1], [0, 0, 1, 1], [], []>} : vector<128x128xbf16>, vector<128x8xbf16>, vector<128x8xf32> -> vector<128x8xf32>
    %65 = vector.extract_strided_slice %7 {offsets = [0, 24], sizes = [128, 8], strides = [1, 1]} : vector<128x96xbf16> to vector<128x8xbf16>
    %66 = vector.extract_strided_slice %7 {offsets = [0, 56], sizes = [128, 8], strides = [1, 1]} : vector<128x96xbf16> to vector<128x8xbf16>
    %67 = vector.extract_strided_slice %7 {offsets = [0, 88], sizes = [128, 8], strides = [1, 1]} : vector<128x96xbf16> to vector<128x8xbf16>
    %cst_24 = arith.constant dense<0.000000e+00> : vector<128x128xf32>
    %68 = tpu.matmul %65, %66, %cst_24 {dimension_numbers = #tpu.dot_dimension_numbers<[1], [1], [0], [0], [0, 0, 1, 0], [], []>} : vector<128x8xbf16>, vector<128x8xbf16>, vector<128x128xf32> -> vector<128x128xf32>
    %c3 = arith.constant 3 : index
    %c0_25 = arith.constant 0 : index
    %c0_26 = arith.constant 0 : index
    %69 = vector.load %arg6[%c3, %c0_25, %c0_26] : memref<4x128x128xf32, #tpu.memory_space<vmem>>, vector<1x128x128xf32>
    %70 = vector.shape_cast %69 : vector<1x128x128xf32> to vector<128x128xf32>
    %71 = arith.addf %68, %70 : vector<128x128xf32>
    %cst_27 = arith.constant dense<0xFF800000> : vector<128xf32>
    %72 = vector.multi_reduction <maximumf>, %71, %cst_27 [1] : vector<128x128xf32> to vector<128xf32>
    %73 = vector.shape_cast %72 : vector<128xf32> to vector<128x1xf32>
    %74 = vector.broadcast %73 : vector<128x1xf32> to vector<128x128xf32>
    %75 = arith.subf %71, %74 : vector<128x128xf32>
    %76 = math.exp %75 : vector<128x128xf32>
    %cst_28 = arith.constant dense<0.000000e+00> : vector<128xf32>
    %77 = vector.multi_reduction <add>, %76, %cst_28 [1] : vector<128x128xf32> to vector<128xf32>
    %78 = vector.shape_cast %77 : vector<128xf32> to vector<128x1xf32>
    %79 = tpu.reciprocal %78 {approx = true} : vector<128x1xf32> -> vector<128x1xf32>
    %80 = vector.broadcast %79 : vector<128x1xf32> to vector<128x128xf32>
    %81 = arith.mulf %76, %80 : vector<128x128xf32>
    %82 = arith.truncf %81 : vector<128x128xf32> to vector<128x128xbf16>
    %cst_29 = arith.constant dense<0.000000e+00> : vector<128x8xf32>
    %83 = tpu.matmul %82, %67, %cst_29 {dimension_numbers = #tpu.dot_dimension_numbers<[1], [0], [0], [1], [0, 0, 1, 1], [], []>} : vector<128x128xbf16>, vector<128x8xbf16>, vector<128x8xf32> -> vector<128x8xf32>
    %84 = tpu.concatenate %26, %45, %64, %83 in 1 : vector<128x8xf32>, vector<128x8xf32>, vector<128x8xf32>, vector<128x8xf32> -> vector<128x32xf32>
    %85 = arith.truncf %84 : vector<128x32xf32> to vector<128x32xbf16>
    %c0_30 = arith.constant 0 : index
    %c0_31 = arith.constant 0 : index
    %86 = vector.load %arg4[%c0_30, %c0_31] : memref<32x32xbf16, #tpu.memory_space<vmem>>, vector<32x32xbf16>
    %cst_32 = arith.constant dense<0.000000e+00> : vector<128x32xf32>
    %87 = tpu.matmul %85, %86, %cst_32 {dimension_numbers = #tpu.dot_dimension_numbers<[1], [0], [0], [1], [0, 0, 1, 1], [], []>} : vector<128x32xbf16>, vector<32x32xbf16>, vector<128x32xf32> -> vector<128x32xf32>
    %c0_33 = arith.constant 0 : index
    %c0_34 = arith.constant 0 : index
    %88 = vector.load %arg5[%c0_33, %c0_34] : memref<1x32xf32, #tpu.memory_space<vmem>>, vector<1x32xf32>
    %89 = vector.broadcast %88 : vector<1x32xf32> to vector<128x32xf32>
    %90 = arith.addf %87, %89 : vector<128x32xf32>
    %c0_35 = arith.constant 0 : index
    %c0_36 = arith.constant 0 : index
    %91 = vector.load %arg7[%c0_35, %c0_36] : memref<128x32xf32, #tpu.memory_space<vmem>>, vector<128x32xf32>
    tpu.vector_store %arg7[%c0_35, %c0_36], %90 {strides = array<i32>} : memref<128x32xf32, #tpu.memory_space<vmem>>, vector<128x32xf32>,
    return
  }
  func.func @transform_0(%arg0: i32) -> (i32, i32) {
    %c0_i32 = arith.constant 0 : i32
    %c0_i32_0 = arith.constant 0 : i32
    return %arg0, %c0_i32 : i32, i32
  }
  func.func @transform_1(%arg0: i32) -> (i32, i32) {
    %c0_i32 = arith.constant 0 : i32
    %c0_i32_0 = arith.constant 0 : i32
    %c0_i32_1 = arith.constant 0 : i32
    return %c0_i32, %c0_i32_0 : i32, i32
  }
  func.func @transform_2(%arg0: i32) -> (i32, i32) {
    %c0_i32 = arith.constant 0 : i32
    %c0_i32_0 = arith.constant 0 : i32
    %c0_i32_1 = arith.constant 0 : i32
    return %c0_i32, %c0_i32_0 : i32, i32
  }
  func.func @transform_3(%arg0: i32) -> (i32, i32) {
    %c0_i32 = arith.constant 0 : i32
    %c0_i32_0 = arith.constant 0 : i32
    %c0_i32_1 = arith.constant 0 : i32
    return %c0_i32, %c0_i32_0 : i32, i32
  }
  func.func @transform_4(%arg0: i32) -> (i32, i32) {
    %c0_i32 = arith.constant 0 : i32
    %c0_i32_0 = arith.constant 0 : i32
    %c0_i32_1 = arith.constant 0 : i32
    return %c0_i32, %c0_i32_0 : i32, i32
  }
  func.func @transform_5(%arg0: i32) -> (i32, i32, i32) {
    %c0_i32 = arith.constant 0 : i32
    %c0_i32_0 = arith.constant 0 : i32
    %c0_i32_1 = arith.constant 0 : i32
    %c0_i32_2 = arith.constant 0 : i32
    return %c0_i32, %c0_i32_0, %c0_i32_1 : i32, i32, i32
  }
  func.func @transform_6(%arg0: i32) -> (i32, i32) {
    %c0_i32 = arith.constant 0 : i32
    %c0_i32_0 = arith.constant 0 : i32
    return %arg0, %c0_i32 : i32, i32
  }
}

</mosaic_0001>

<bundles_post_ra>
// kernel: tpu_custom_call.1
= control target key start
LH: loop header
LB: loop body
LE: loop exit
PB: predicated region body
PF: predicated region fallthrough
CT: control target
= control target key end

     0   :  { %s3823_s21 = smov 0   ;;  %s5181_s0 = inlined_call_operand.vmem [shape: f32[512,32], index: 0, kind: input, shape index: {}]   ;;  %s5182_s1 = inlined_call_operand.vmem [shape: bf16[32,96], index: 1, kind: input, shape index: {}]   ;;  %s5183_s2 = inlined_call_operand.vmem [shape: f32[1,96], index: 2, kind: input, shape index: {}]   ;;  %s5184_s3 = inlined_call_operand.vmem [shape: bf16[32,32], index: 3, kind: input, shape index: {}]   ;;  %s5185_s4 = inlined_call_operand.vmem [shape: f32[1,32], index: 4, kind: input, shape index: {}]   ;;  %s5186_s5 = inlined_call_operand.vmem [shape: f32[4,128,128], index: 5, kind: input, shape index: {}]   ;;  %s5187_s6 = inlined_call_operand.vmem [shape: f32[512,32], index: 6, kind: output, shape index: {}]  }
   0x1 LB: > { %s2759_s22 = sadd.s32 4294967295, %s3772_s21   ;;  %p2763_p0 = scmp.ge.s32.totalorder %s3772_s21, 1  ;;  %s3772_s21 = sphi %s3823_s21, %s16_s21  }
   0x2   : > { %p213_p1 = scmp.lt.s32.totalorder %s3772_s21, 5 }
   0x4   : > { %p214_p2 = pnand %p2763_p0, %p213_p1 }
   0x6   : > { %217 = sbr.rel (%p214_p2) target bundleno = 3595 (0xe0b), region = 44 }
   0xd   : > { %v3506_v0 = vld [vmem:[%s5182_s1] sm:$0xff]   ;;  %s2764_s25 = sshll.u32 %s2759_s22, 4  ;;  %v3507_v1 = vld [vmem:[%s5182_s1 + $0x8] sm:$0xff]   ;;  %vm303_vm0 = vcmask 261120   ;;  %vm473_vm1 = vcmask 64512   ;;  %s3774_s10 = smov 96  }
   0xe   : > { %p244_p3 = scmp.lt.s32.totalorder %s2764_s25, 63  ;;  %3020 = vmatprep.subr.bf16.mxu0 %v3506_v0  ;;  %v2768_v27 = vld [vmem:[%s5183_s2] ss:$0 sm:$0xff]  ;;  %s3775_s11 = smov 64   ;;  %vm2501_vm2 = vcmask 130048   ;;  %vm2518_vm3 = vcmask 195584  }
   0xf   : > { %3021 = vmatpush3.bf16.msra.mxu0 %v3506_v0  ;;  %s3776_s20 = smov 88   ;;  %s3777_s27 = smov 120  }
  0x10   : > { %s5237_s25 = smov (!%p244_p3, %s2764_s25), 63  ;;  %3022 = vmatprep.subr.bf16.mxu0 %v3507_v1  ;;  %s3778_s29 = smov 56  }
  0x11   : > { %s2765_s28 = sshll.u32 %s5237_s25, 3  ;;  %s3780_s18 = smov 112  }
  0x12   : > { %s3845_s7 = scalar_lea.vmem %s5181_s0, %s2765_s28  ;;  %s3781_s19 = smov 48  }
  0x13   : > { %3023 = vmatpush3.bf16.msra.mxu0 %v3507_v1  ;;  %v256_v2 = vld [vmem:[%s3845_s7] sm:$0xff]  ;;  %v257_v3 = vld [vmem:[%s3845_s7 + $0x8] sm:$0xff]  ;;  %v258_v4 = vld [vmem:[%s3845_s7 + $0x10] sm:$0xff]  ;;  %s3783_s12 = smov 104   ;;  %s3784_s13 = smov 40  }
  0x14   : > { %v272_v5 = vpack.c.bf16 %v257_v3, %v256_v2  ;;  %v259_v6 = vld [vmem:[%s3845_s7 + $0x18] sm:$0xff]  ;;  %v260_v7 = vld [vmem:[%s3845_s7 + $0x20] sm:$0xff]  ;;  %v261_v8 = vld [vmem:[%s3845_s7 + $0x28] sm:$0xff]  ;;  %s3787_s9 = smov 24   ;;  %s5144_s15 = scalar_lea.vmem %s5187_s6, %s2765_s28 }
  0x15   : > { %v273_v9 = vpack.c.bf16 %v259_v6, %v258_v4  ;;  %v274_v10 = vpack.c.bf16 %v261_v8, %v260_v7  ;;  %v262_v11 = vld [vmem:[%s3845_s7 + $0x30] sm:$0xff]  ;;  %v263_v12 = vld [vmem:[%s3845_s7 + $0x38] sm:$0xff]  ;;  %v264_v13 = vld [vmem:[%s3845_s7 + $0x40] sm:$0xff] }
  0x16   : > { %3024 = vmatprep.mubr.msk.bf16.mxu0 %vm303_vm0, %v272_v5  ;;  %v265_v14 = vld [vmem:[%s3845_s7 + $0x48] sm:$0xff]  ;;  %v275_v15 = vpack.c.bf16 %v263_v12, %v262_v11  ;;  %v266_v17 = vld [vmem:[%s3845_s7 + $0x50] sm:$0xff]  ;;  %v267_v18 = vld [vmem:[%s3845_s7 + $0x58] sm:$0xff] }
  0x17   : > { %3025 = vmatmul.mubr.msk.bf16.vlgmr.msra.gmra.mrb[0].mxu0 %vm303_vm0, %v273_v9  ;;  %v276_v16 = vpack.c.bf16 %v265_v14, %v264_v13  ;;  %v268_v19 = vld [vmem:[%s3845_s7 + $0x60] sm:$0xff]  ;;  %v269_v20 = vld [vmem:[%s3845_s7 + $0x68] sm:$0xff]  ;;  %v277_v21 = vpack.c.bf16 %v267_v18, %v266_v17  ;;  %v270_v23 = vld [vmem:[%s3845_s7 + $0x70] sm:$0xff] }
  0x18   : > { %3028 = vmatprep.mubr.msk.bf16.mxu0 %vm303_vm0, %v274_v10  ;;  %v278_v22 = vpack.c.bf16 %v269_v20, %v268_v19  ;;  %v271_v24 = vld [vmem:[%s3845_s7 + $0x78] sm:$0xff] }
  0x19   : > { %v279_v25 = vpack.c.bf16 %v271_v24, %v270_v23 }
  0x1f   : > { %3029 = vmatmul.mubr.msk.bf16.gmra.mrb[4].mxu0 %vm303_vm0, %v275_v15 }
  0x20   : > { %3032 = vmatprep.mubr.msk.bf16.mxu0 %vm303_vm0, %v276_v16 }
  0x27   : > { %3033 = vmatmul.mubr.msk.bf16.gmra.mrb[8].mxu0 %vm303_vm0, %v277_v21 }
  0x28   : > { %3036 = vmatprep.mubr.msk.bf16.mxu0 %vm303_vm0, %v278_v22 }
  0x2f   : > { %3037 = vmatmul.mubr.msk.bf16.gmra.mrb[12].mxu0 %vm303_vm0, %v279_v25 }
  0xea   : > { %v3026_v26 = vpop.f32.mrb[0].mxu0 }
  0xeb   : > { %v362_v28 = vpop.f32.mrb[1].mxu0  ;;  %v371_v30 = vadd.f32 %v3026_v26, %v2768_v27 }
  0xec   : > { %v3027_v29 = vpop.f32.mrb[2].mxu0  ;;  %v363_v33 = vadd.f32 %v2768_v27, %v362_v28 }
  0xed   : > { %v374_v31 = vadd.f32 %v3027_v29, %v2768_v27  ;;  %v365_v32 = vpop.f32.mrb[3].mxu0 }
  0xee   : > { %v366_v34 = vadd.f32 %v2768_v27, %v365_v32  ;;  %v433_v32 = vld [vmem:[%s5186_s5] sm:$0xff] }
  0xef   : > { %v3874_v35 = vpack.c.bf16 %v374_v31, %v371_v30  ;;  %v434_v31 = vld [vmem:[%s5186_s5 + $0x8] sm:$0xff] }
  0xf0   : > { %v3876_v36 = vpack.c.bf16 %v366_v34, %v363_v33 }
  0xf2   : > { %457 = vrot.lane.b32.xlu0 %v3876_v36, %s3774_s10  ;;  %3056 = vmatprep.mubr.msk.bf16.mxu1 %vm473_vm1, %v3876_v36  ;;  %v3030_v37 = vpop.f32.mrb[4].mxu0 }
  0xf3   : > { %v387_v38 = vadd.f32 %v3030_v37, %v2768_v27  ;;  %v378_v39 = vpop.f32.mrb[5].mxu0 }
  0xf4   : > { %v379_v40 = vadd.f32 %v2768_v27, %v378_v39  ;;  %v3031_v41 = vpop.f32.mrb[6].mxu0  ;;  %v436_v39 = vld [vmem:[%s5186_s5 + $0x18] sm:$0xff] }
  0xf5   : > { %v390_v42 = vadd.f32 %v3031_v41, %v2768_v27  ;;  %v381_v43 = vpop.f32.mrb[7].mxu0 }
  0xf6   : > { %v382_v44 = vadd.f32 %v2768_v27, %v381_v43  ;;  %459 = vrot.lane.b32.xlu0 %v3874_v35, %s3774_s10 }
  0xf7   : > { %v3884_v45 = vpack.c.bf16 %v390_v42, %v387_v38 }
  0xf8   : > { %v3886_v46 = vpack.c.bf16 %v382_v44, %v379_v40 }
  0xfa   : > { %461 = vrot.lane.b32.xlu1 %v3886_v46, %s3774_s10  ;;  %v3034_v47 = vpop.f32.mrb[8].mxu0 }
  0xfb   : > { %v403_v48 = vadd.f32 %v3034_v47, %v2768_v27  ;;  %v394_v49 = vpop.f32.mrb[9].mxu0 }
  0xfc   : > { %v395_v50 = vadd.f32 %v2768_v27, %v394_v49  ;;  %v3035_v51 = vpop.f32.mrb[10].mxu0 }
  0xfd   : > { %v406_v52 = vadd.f32 %v3035_v51, %v2768_v27  ;;  %v397_v53 = vpop.f32.mrb[11].mxu0 }
  0xfe   : > { %463 = vrot.lane.b32.xlu1 %v3884_v45, %s3774_s10  ;;  %v398_v54 = vadd.f32 %v2768_v27, %v397_v53 }
  0xff   : > { %v3892_v55 = vpack.c.bf16 %v406_v52, %v403_v48 }
 0x100   : > { %v3894_v56 = vpack.c.bf16 %v398_v54, %v395_v50 }
 0x102   : > { %v3038_v57 = vpop.f32.mrb[12].mxu0  ;;  %467 = vrot.lane.b32.xlu1 %v3892_v55, %s3774_s10  ;;  %465 = vrot.lane.b32.xlu0 %v3894_v56, %s3774_s10 }
 0x103   : > { %v419_v58 = vadd.f32 %v3038_v57, %v2768_v27  ;;  %v410_v59 = vpop.f32.mrb[13].mxu0  ;;  %v439_v57 = vld [vmem:[%s5186_s5 + $0x30] sm:$0xff] }
 0x104   : > { %v411_v60 = vadd.f32 %v2768_v27, %v410_v59  ;;  %v3039_v61 = vpop.f32.mrb[14].mxu0  ;;  %v437_v59 = vld [vmem:[%s5186_s5 + $0x20] sm:$0xff] }
 0x105   : > { %v422_v62 = vadd.f32 %v3039_v61, %v2768_v27  ;;  %v413_v63 = vpop.f32.mrb[15].mxu0 }
 0x106   : > { %v414_v0 = vadd.f32 %v2768_v27, %v413_v63  ;;  %v435_v27 = vld [vmem:[%s5186_s5 + $0x10] sm:$0xff] }
 0x107   : > { %v3900_v1 = vpack.c.bf16 %v422_v62, %v419_v58  ;;  %v443_v63 = vld [vmem:[%s5186_s5 + $0x50] sm:$0xff] }
 0x108   : > { %v3902_v2 = vpack.c.bf16 %v414_v0, %v411_v60  ;;  %v440_v60 = vld [vmem:[%s5186_s5 + $0x38] sm:$0xff]  ;;  %v438_v0 = vld [vmem:[%s5186_s5 + $0x28] sm:$0xff] }
 0x109   : > { %471 = vrot.lane.b32.xlu1 %v3900_v1, %s3774_s10 }
 0x10a   : > { %469 = vrot.lane.b32.xlu0 %v3902_v2, %s3774_s10 }
 0x10d   : > { %771 = vrot.lane.b32.xlu1 %v3876_v36, %s3775_s11 }
 0x10e   : > { %773 = vrot.lane.b32.xlu0 %v3874_v35, %s3775_s11 }
 0x111   : > { %775 = vrot.lane.b32.xlu1 %v3886_v46, %s3775_s11 }
 0x112   : > { %777 = vrot.lane.b32.xlu0 %v3884_v45, %s3775_s11 }
 0x115   : > { %779 = vrot.lane.b32.xlu1 %v3894_v56, %s3775_s11 }
 0x119   : > { %781 = vrot.lane.b32.xlu1 %v3892_v55, %s3775_s11 }
 0x11d   : > { %785 = vrot.lane.b32.xlu1 %v3900_v1, %s3775_s11 }
 0x121   : > { %783 = vrot.lane.b32.xlu1 %v3902_v2, %s3775_s11  ;;  %s3779_s11 = smov 80  }
 0x164   : > { %v458_v3 = vpop.permute.xlu0 %457 }
 0x165   : > { %3332 = vmatprep.subr.msk.bf16.mxu1 %vm473_vm1, %v458_v3  ;;  %v499_v4 = vsel %vm473_vm1, %v458_v3, 0 }
 0x166   : > { %3041 = vmatpush3.bf16.xpose.msra.mxu1 %v499_v4 }
 0x168   : > { %v460_v5 = vpop.permute.xlu0 %459 }
 0x169   : > { %3333 = vmatprep.subr.msk.bf16.mxu1 %vm473_vm1, %v460_v5  ;;  %v502_v7 = vsel %vm473_vm1, %v460_v5, 0  ;;  %v441_v5 = vld [vmem:[%s5186_s5 + $0x40] sm:$0xff] }
 0x16c   : > { %v462_v6 = vpop.permute.xlu1 %461 }
 0x16d   : > { %v505_v9 = vsel %vm473_vm1, %v462_v6, 0 }
 0x16e   : > { %3043 = vmatpush3.bf16.xpose.msra.mxu1 %v502_v7 }
 0x16f   : > { %3334 = vmatprep.subr.msk.bf16.mxu1 %vm473_vm1, %v462_v6  ;;  %v444_v6 = vld [vmem:[%s5186_s5 + $0x58] sm:$0xff] }
 0x170   : > { %v464_v8 = vpop.permute.xlu1 %463 }
 0x171   : > { %v508_v14 = vsel %vm473_vm1, %v464_v8, 0 }
 0x174   : > { %v468_v10 = vpop.permute.xlu1 %467  ;;  %v466_v11 = vpop.permute.xlu0 %465 }
 0x175   : > { %v511_v18 = vsel %vm473_vm1, %v466_v11, 0  ;;  %v514_v22 = vsel %vm473_vm1, %v468_v10, 0 }
 0x176   : > { %3045 = vmatpush3.bf16.xpose.msra.mxu1 %v505_v9  ;;  %v447_v9 = vld [vmem:[%s5186_s5 + $0x70] sm:$0xff] }
 0x177   : > { %3335 = vmatprep.subr.msk.bf16.mxu1 %vm473_vm1, %v464_v8 }
 0x17b   : > { %v472_v12 = vpop.permute.xlu1 %471 }
 0x17c   : > { %v470_v13 = vpop.permute.xlu0 %469  ;;  %v520_v26 = vsel %vm473_vm1, %v472_v12, 0 }
 0x17d   : > { %v517_v25 = vsel %vm473_vm1, %v470_v13, 0 }
 0x17e   : > { %3047 = vmatpush3.bf16.xpose.msra.mxu1 %v508_v14  ;;  %v448_v14 = vld [vmem:[%s5186_s5 + $0x78] sm:$0xff] }
 0x17f   : > { %v772_v15 = vpop.permute.xlu1 %771  ;;  %3336 = vmatprep.subr.msk.bf16.mxu1 %vm473_vm1, %v466_v11 }
 0x180   : > { %3072 = vmatprep.subr.bf16.mxu0 %v772_v15  ;;  %v774_v16 = vpop.permute.xlu0 %773 }
 0x181   : > { %3073 = vmatpush3.bf16.msra.mxu0 %v772_v15 }
 0x182   : > { %3074 = vmatprep.subr.bf16.mxu0 %v774_v16 }
 0x183   : > { %v776_v17 = vpop.permute.xlu1 %775 }
 0x184   : > { %v778_v20 = vpop.permute.xlu0 %777 }
 0x185   : > { %3075 = vmatpush3.bf16.msra.mxu0 %v774_v16 }
 0x186   : > { %3049 = vmatpush3.bf16.xpose.msra.mxu1 %v511_v18  ;;  %3076 = vmatprep.subr.bf16.mxu0 %v776_v17 }
 0x187   : > { %v780_v19 = vpop.permute.xlu1 %779  ;;  %3337 = vmatprep.subr.msk.bf16.mxu1 %vm473_vm1, %v468_v10  ;;  %v442_v10 = vld [vmem:[%s5186_s5 + $0x48] sm:$0xff] }
 0x189   : > { %3077 = vmatpush3.bf16.msra.mxu0 %v776_v17  ;;  %v446_v17 = vld [vmem:[%s5186_s5 + $0x68] sm:$0xff] }
 0x18a   : > { %3078 = vmatprep.subr.bf16.mxu0 %v778_v20 }
 0x18b   : > { %v782_v21 = vpop.permute.xlu1 %781 }
 0x18d   : > { %3079 = vmatpush3.bf16.msra.mxu0 %v778_v20 }
 0x18e   : > { %3051 = vmatpush3.bf16.xpose.msra.mxu1 %v514_v22  ;;  %3080 = vmatprep.subr.bf16.mxu0 %v780_v19 }
 0x18f   : > { %v786_v23 = vpop.permute.xlu1 %785  ;;  %3338 = vmatprep.subr.msk.bf16.mxu1 %vm473_vm1, %v470_v13  ;;  %v445_v13 = vld [vmem:[%s5186_s5 + $0x60] sm:$0xff] }
 0x191   : > { %3081 = vmatpush3.bf16.msra.mxu0 %v780_v19 }
 0x192   : > { %3082 = vmatprep.subr.bf16.mxu0 %v782_v21 }
 0x193   : > { %v784_v24 = vpop.permute.xlu1 %783 }
 0x195   : > { %3083 = vmatpush3.bf16.msra.mxu0 %v782_v21 }
 0x196   : > { %3053 = vmatpush3.bf16.xpose.msra.mxu1 %v517_v25  ;;  %3084 = vmatprep.subr.bf16.mxu0 %v784_v24 }
 0x197   : > { %3339 = vmatprep.subr.msk.bf16.mxu1 %vm473_vm1, %v472_v12 }
 0x199   : > { %3085 = vmatpush3.bf16.msra.mxu0 %v784_v24 }
 0x19a   : > { %3086 = vmatprep.subr.bf16.mxu0 %v786_v23 }
 0x19d   : > { %3087 = vmatpush3.bf16.msra.mxu0 %v786_v23 }
 0x19e   : > { %3055 = vmatpush3.bf16.xpose.msra.mxu1 %v520_v26 }
 0x1a5   : > { %3057 = vmatmul.mubr.msk.bf16.vlgmr.msra.gmra.mrb[0].mxu1 %vm473_vm1, %v3874_v35 }
 0x1a6   : > { %3060 = vmatprep.mubr.msk.bf16.mxu1 %vm473_vm1, %v3886_v46 }
 0x1ad   : > { %3061 = vmatmul.mubr.msk.bf16.gmra.mrb[4].mxu1 %vm473_vm1, %v3884_v45 }
 0x1ae   : > { %3064 = vmatprep.mubr.msk.bf16.mxu1 %vm473_vm1, %v3894_v56 }
 0x1b5   : > { %3065 = vmatmul.mubr.msk.bf16.gmra.mrb[8].mxu1 %vm473_vm1, %v3892_v55 }
 0x1b6   : > { %3068 = vmatprep.mubr.msk.bf16.mxu1 %vm473_vm1, %v3902_v2 }
 0x1bd   : > { %3069 = vmatmul.mubr.msk.bf16.gmra.mrb[12].mxu1 %vm473_vm1, %v3900_v1 }
 0x278   : > { %v3058_v28 = vpop.f32.mrb[0].mxu1 }
 0x279   : > { %v3949_v29 = vadd.f32 %v3058_v28, %v435_v27  ;;  %v556_v30 = vpop.f32.mrb[1].mxu1 }
 0x27a   : > { %v3059_v33 = vpop.f32.mrb[2].mxu1  ;;  %v3960_v38 = vadd.f32 %v556_v30, %v433_v32 }
 0x27b   : > { %623 = vmax.xlane.f32.xlu0 %v3949_v29  ;;  %v559_v34 = vpop.f32.mrb[3].mxu1  ;;  %v3967_v41 = vadd.f32 %v3059_v33, %v436_v39 }
 0x27c   : > { %v3958_v37 = vadd.f32 %v559_v34, %v434_v31 }
 0x27e   : > { %621 = vmax.xlane.f32.xlu1 %v3958_v37 }
 0x27f   : > { %619 = vmax.xlane.f32.xlu0 %v3960_v38 }
 0x280   : > { %v3062_v40 = vpop.f32.mrb[4].mxu1 }
 0x281   : > { %v572_v42 = vpop.f32.mrb[5].mxu1  ;;  %v3977_v58 = vadd.f32 %v3062_v40, %v439_v57 }
 0x282   : > { %v3063_v43 = vpop.f32.mrb[6].mxu1  ;;  %v3986_v61 = vadd.f32 %v572_v42, %v437_v59 }
 0x283   : > { %v575_v44 = vpop.f32.mrb[7].mxu1  ;;  %625 = vmax.xlane.f32.xlu0 %v3967_v41  ;;  %v3988_v62 = vadd.f32 %v3063_v43, %v440_v60 }
 0x284   : > { %v4000_v4 = vadd.f32 %v575_v44, %v438_v0 }
 0x288   : > { %v3066_v47 = vpop.f32.mrb[8].mxu1 }
 0x289   : > { %v588_v48 = vpop.f32.mrb[9].mxu1  ;;  %v3998_v3 = vadd.f32 %v3066_v47, %v443_v63 }
 0x28a   : > { %v3067_v49 = vpop.f32.mrb[10].mxu1  ;;  %v4010_v7 = vadd.f32 %v588_v48, %v441_v5 }
 0x28b   : > { %v591_v50 = vpop.f32.mrb[11].mxu1  ;;  %v4012_v8 = vadd.f32 %v3067_v49, %v444_v6 }
 0x28c   : > { %v4024_v12 = vadd.f32 %v591_v50, %v442_v10 }
 0x28f   : > { %927 = vrot.lane.b32.xlu1 %v3874_v35, %s3776_s20 }
 0x290   : > { %v3070_v51 = vpop.f32.mrb[12].mxu1 }
 0x291   : > { %v604_v52 = vpop.f32.mrb[13].mxu1  ;;  %v4022_v11 = vadd.f32 %v3070_v51, %v447_v9 }
 0x292   : > { %v3071_v53 = vpop.f32.mrb[14].mxu1  ;;  %v4034_v15 = vadd.f32 %v604_v52, %v445_v13 }
 0x293   : > { %v607_v54 = vpop.f32.mrb[15].mxu1  ;;  %v4036_v16 = vadd.f32 %v3071_v53, %v448_v14 }
 0x294   : > { %v4043_v18 = vadd.f32 %v607_v54, %v446_v17 }
 0x299   : > { %925 = vrot.lane.b32.xlu0 %v3876_v36, %s3776_s20 }
 0x2b3   : > { %631 = vmax.xlane.f32.xlu1 %v3977_v58 }
 0x2b7   : > { %627 = vmax.xlane.f32.xlu1 %v3986_v61 }
 0x2b8   : > { %633 = vmax.xlane.f32.xlu0 %v3988_v62 }
 0x2bb   : > { %639 = vmax.xlane.f32.xlu1 %v3998_v3 }
 0x2bc   : > { %629 = vmax.xlane.f32.xlu0 %v4000_v4 }
 0x2bf   : > { %635 = vmax.xlane.f32.xlu1 %v4010_v7 }
 0x2c0   : > { %641 = vmax.xlane.f32.xlu0 %v4012_v8 }
 0x2c3   : > { %647 = vmax.xlane.f32.xlu1 %v4022_v11 }
 0x2c4   : > { %637 = vmax.xlane.f32.xlu0 %v4024_v12 }
 0x2c7   : > { %643 = vmax.xlane.f32.xlu1 %v4034_v15 }
 0x2c8   : > { %649 = vmax.xlane.f32.xlu0 %v4036_v16 }
 0x2cc   : > { %645 = vmax.xlane.f32.xlu0 %v4043_v18 }
 0x2d8   : > { %929 = vrot.lane.b32.xlu1 %v3886_v46, %s3776_s20 }
 0x308   : > { %v624_v19 = vpop.xlane.xlu0 %623 }
 0x309   : > { %v653_v20 = vsub.f32 %v3949_v29, %v624_v19 }
 0x30b   : > { %v671_v21 = vmul.f32 1.442695, %v653_v20  ;;  %v622_v24 = vpop.xlane.xlu1 %621 }
 0x30c   : > { %v620_v22 = vpop.xlane.xlu0 %619  ;;  %v652_v27 = vsub.f32 %v3958_v37, %v622_v24 }
 0x30d   : > { %3510 = vpow2.f32 %v671_v21  ;;  %v651_v23 = vsub.f32 %v3960_v38, %v620_v22 }
 0x30e   : > { %v669_v32 = vmul.f32 1.442695, %v652_v27 }
 0x30f   : > { %v667_v25 = vmul.f32 1.442695, %v651_v23  ;;  %v4068_v38 = vpop.permute.xlu1 %927 }
 0x310   : > { %v626_v26 = vpop.xlane.xlu0 %625 }
 0x311   : > { %3512 = vpow2.f32 %v667_v25  ;;  %v654_v28 = vsub.f32 %v3967_v41, %v626_v26 }
 0x313   : > { %v673_v30 = vmul.f32 1.442695, %v654_v28 }
 0x314   : > { %v4052_v31 = vpop.permute.xlu0 %925 }
 0x315   : > { %3514 = vpow2.f32 %v673_v30  ;;  %3340 = vmatprep.subr.msk.bf16.mxu0 %vm473_vm1, %v4052_v31 }
 0x316   : > { %3516 = vpow2.f32 %v669_v32 }
 0x317   : > { %v4056_v29 = vpop.eup %3510 }
 0x318   : > { %703 = vadd.xlane.f32.xlu0 %v4056_v29 }
 0x31b   : > { %v4059_v33 = vpop.eup %3512 }
 0x31c   : > { %699 = vadd.xlane.f32.xlu1 %v4059_v33 }
 0x31f   : > { %v4062_v34 = vpop.eup %3514 }
 0x320   : > { %705 = vadd.xlane.f32.xlu0 %v4062_v34  ;;  %v4065_v37 = vpop.eup %3516 }
 0x324   : > { %701 = vadd.xlane.f32.xlu0 %v4065_v37 }
 0x340   : > { %v632_v39 = vpop.xlane.xlu1 %631 }
 0x341   : > { %v657_v40 = vsub.f32 %v3977_v58, %v632_v39 }
 0x343   : > { %v679_v41 = vmul.f32 1.442695, %v657_v40 }
 0x344   : > { %v628_v42 = vpop.xlane.xlu1 %627 }
 0x345   : > { %3518 = vpow2.f32 %v679_v41  ;;  %v655_v43 = vsub.f32 %v3986_v61, %v628_v42  ;;  %v634_v44 = vpop.xlane.xlu0 %633 }
 0x346   : > { %v658_v47 = vsub.f32 %v3988_v62, %v634_v44 }
 0x347   : > { %v675_v48 = vmul.f32 1.442695, %v655_v43 }
 0x348   : > { %v681_v49 = vmul.f32 1.442695, %v658_v47  ;;  %v640_v63 = vpop.xlane.xlu1 %639 }
 0x349   : > { %3520 = vpow2.f32 %v675_v48  ;;  %v630_v50 = vpop.xlane.xlu0 %629 }
 0x34a   : > { %v656_v51 = vsub.f32 %v4000_v4, %v630_v50  ;;  %3522 = vpow2.f32 %v681_v49  ;;  %v661_v4 = vsub.f32 %v3998_v3, %v640_v63 }
 0x34c   : > { %v677_v52 = vmul.f32 1.442695, %v656_v51  ;;  %v636_v5 = vpop.xlane.xlu1 %635  ;;  %v687_v9 = vmul.f32 1.442695, %v661_v4 }
 0x34d   : > { %v642_v59 = vpop.xlane.xlu0 %641  ;;  %v659_v10 = vsub.f32 %v4010_v7, %v636_v5 }
 0x34e   : > { %3524 = vpow2.f32 %v677_v52  ;;  %v662_v14 = vsub.f32 %v4012_v8, %v642_v59 }
 0x34f   : > { %v4074_v53 = vpop.eup %3518  ;;  %v683_v13 = vmul.f32 1.442695, %v659_v10 }
 0x350   : > { %711 = vadd.xlane.f32.xlu0 %v4074_v53  ;;  %v648_v17 = vpop.xlane.xlu1 %647  ;;  %v689_v19 = vmul.f32 1.442695, %v662_v14 }
 0x351   : > { %v638_v60 = vpop.xlane.xlu0 %637  ;;  %v665_v3 = vsub.f32 %v4022_v11, %v648_v17 }
 0x352   : > { %v660_v20 = vsub.f32 %v4024_v12, %v638_v60  ;;  %v966_v60 = vsel %vm473_vm1, %v4052_v31, 0 }
 0x353   : > { %v4077_v54 = vpop.eup %3520  ;;  %v695_v23 = vmul.f32 1.442695, %v665_v3 }
 0x354   : > { %707 = vadd.xlane.f32.xlu0 %v4077_v54  ;;  %v4080_v57 = vpop.eup %3522  ;;  %v644_v22 = vpop.xlane.xlu1 %643 }
 0x355   : > { %v650_v61 = vpop.xlane.xlu0 %649  ;;  %v663_v8 = vsub.f32 %v4034_v15, %v644_v22 }
 0x356   : > { %v666_v11 = vsub.f32 %v4036_v16, %v650_v61 }
 0x357   : > { %v691_v12 = vmul.f32 1.442695, %v663_v8 }
 0x358   : > { %v4082_v58 = vpop.eup %3524  ;;  %713 = vadd.xlane.f32.xlu0 %v4080_v57  ;;  %v697_v26 = vmul.f32 1.442695, %v666_v11  ;;  %v930_v30 = vpop.permute.xlu1 %929 }
 0x359   : > { %709 = vadd.xlane.f32.xlu1 %v4082_v58  ;;  %v646_v62 = vpop.xlane.xlu0 %645  ;;  %v972_v31 = vsel %vm473_vm1, %v930_v30, 0 }
 0x35a   : > { %v664_v0 = vsub.f32 %v4043_v18, %v646_v62  ;;  %v685_v18 = vmul.f32 1.442695, %v660_v20 }
 0x35c   : > { %v693_v6 = vmul.f32 1.442695, %v664_v0 }
 0x35e   : > { %3526 = vpow2.f32 %v693_v6 }
 0x35f   : > { %3528 = vpow2.f32 %v687_v9 }
 0x360   : > { %3530 = vpow2.f32 %v683_v13 }
 0x361   : > { %3532 = vpow2.f32 %v689_v19 }
 0x362   : > { %3534 = vpow2.f32 %v685_v18 }
 0x363   : > { %3536 = vpow2.f32 %v695_v23 }
 0x364   : > { %3538 = vpow2.f32 %v691_v12 }
 0x365   : > { %3540 = vpow2.f32 %v697_v26 }
 0x368   : > { %v4097_v21 = vpop.eup %3526 }
 0x369   : > { %v4101_v7 = vpop.eup %3528 }
 0x36a   : > { %931 = vrot.lane.b32.xlu1 %v3884_v45, %s3776_s20  ;;  %v4105_v24 = vpop.eup %3530 }
 0x36b   : > { %v4109_v25 = vpop.eup %3532 }
 0x36c   : > { %v4112_v27 = vpop.eup %3534 }
 0x36d   : > { %v4117_v15 = vpop.eup %3536 }
 0x36e   : > { %933 = vrot.lane.b32.xlu0 %v3894_v56, %s3776_s20  ;;  %v4122_v16 = vpop.eup %3538 }
 0x36f   : > { %v4127_v28 = vpop.eup %3540 }
 0x372   : > { %935 = vrot.lane.b32.xlu0 %v3892_v55, %s3776_s20 }
 0x38e   : > { %725 = vadd.xlane.f32.xlu1 %v4097_v21 }
 0x391   : > { %719 = vadd.xlane.f32.xlu0 %v4101_v7 }
 0x395   : > { %715 = vadd.xlane.f32.xlu0 %v4105_v24 }
 0x399   : > { %721 = vadd.xlane.f32.xlu0 %v4109_v25 }
 0x39d   : > { %717 = vadd.xlane.f32.xlu0 %v4112_v27 }
 0x39f   : > { %939 = vrot.lane.b32.xlu1 %v3900_v1, %s3776_s20 }
 0x3a1   : > { %727 = vadd.xlane.f32.xlu0 %v4117_v15 }
 0x3a3   : > { %917 = vrot.lane.b32.xlu1 %v3894_v56, %s3777_s27 }
 0x3a5   : > { %723 = vadd.xlane.f32.xlu0 %v4122_v16  ;;  %v704_v32 = vpop.xlane.xlu0 %703 }
 0x3a7   : > { %921 = vrot.lane.b32.xlu1 %v3902_v2, %s3777_s27 }
 0x3a9   : > { %729 = vadd.xlane.f32.xlu0 %v4127_v28  ;;  %v700_v39 = vpop.xlane.xlu1 %699 }
 0x3ab   : > { %1240 = vrot.lane.b32.xlu1 %v3874_v35, %s3778_s29 }
 0x3ad   : > { %v706_v40 = vpop.xlane.xlu0 %705 }
 0x3ae   : > { %3542 = vrcp.f32 %v706_v40 }
 0x3af   : > { %1244 = vrot.lane.b32.xlu1 %v3884_v45, %s3778_s29  ;;  %3544 = vrcp.f32 %v700_v39 }
 0x3b0   : > { %3546 = vrcp.f32 %v704_v32 }
 0x3b1   : > { %v702_v41 = vpop.xlane.xlu0 %701 }
 0x3b2   : > { %3548 = vrcp.f32 %v702_v41 }
 0x3b3   : > { %1250 = vrot.lane.b32.xlu1 %v3902_v2, %s3778_s29 }
 0x3b8   : > { %v3543_v42 = vpop.eup %3542 }
 0x3b9   : > { %v3545_v43 = vpop.eup %3544  ;;  %v750_v48 = vmul.f32 %v3543_v42, %v4062_v34 }
 0x3ba   : > { %v3547_v44 = vpop.eup %3546  ;;  %v747_v49 = vmul.f32 %v3545_v43, %v4059_v33 }
 0x3bb   : > { %v749_v51 = vmul.f32 %v3547_v44, %v4056_v29  ;;  %v969_v29 = vsel %vm473_vm1, %v4068_v38, 0 }
 0x3bc   : > { %v3549_v47 = vpop.eup %3548 }
 0x3bd   : > { %v748_v50 = vmul.f32 %v3549_v47, %v4065_v37  ;;  %v764_v59 = vpack.c.bf16 %v750_v48, %v749_v51 }
 0x3bf   : > { %937 = vrot.lane.b32.xlu0 %v3902_v2, %s3776_s20  ;;  %v763_v52 = vpack.c.bf16 %v748_v50, %v747_v49  ;;  %s3786_s20 = smov 16  }
 0x3c1   : > { %3088 = vmatprep.mubr.bf16.mxu0 %v763_v52 }
 0x3c2   : > { %3089 = vmatmul.mubr.bf16.vlgmr.msra.gmra.mrb[16].mxu0 %v764_v59 }
 0x3c3   : > { %3105 = vmatpush3.bf16.xpose.msra.mxu0 %v966_v60  ;;  %909 = vrot.lane.b32.xlu0 %v3876_v36, %s3777_s27 }
 0x3c4   : > { %3341 = vmatprep.subr.msk.bf16.mxu0 %vm473_vm1, %v4068_v38 }
 0x3c7   : > { %911 = vrot.lane.b32.xlu0 %v3874_v35, %s3777_s27 }
 0x3cb   : > { %3107 = vmatpush3.bf16.xpose.msra.mxu0 %v969_v29  ;;  %913 = vrot.lane.b32.xlu0 %v3886_v46, %s3777_s27 }
 0x3cc   : > { %3342 = vmatprep.subr.msk.bf16.mxu0 %vm473_vm1, %v930_v30 }
 0x3cf   : > { %915 = vrot.lane.b32.xlu0 %v3884_v45, %s3777_s27 }
 0x3d3   : > { %3109 = vmatpush3.bf16.xpose.msra.mxu0 %v972_v31  ;;  %919 = vrot.lane.b32.xlu0 %v3892_v55, %s3777_s27 }
 0x3d7   : > { %923 = vrot.lane.b32.xlu0 %v3900_v1, %s3777_s27  ;;  %s3785_s27 = smov 8  }
 0x3db   : > { %1238 = vrot.lane.b32.xlu0 %v3876_v36, %s3778_s29 }
 0x3dd   : > { %v712_v33 = vpop.xlane.xlu0 %711 }
 0x3de   : > { %3550 = vrcp.f32 %v712_v33 }
 0x3df   : > { %1242 = vrot.lane.b32.xlu0 %v3886_v46, %s3778_s29 }
 0x3e1   : > { %v708_v34 = vpop.xlane.xlu0 %707 }
 0x3e2   : > { %3552 = vrcp.f32 %v708_v34 }
 0x3e3   : > { %1246 = vrot.lane.b32.xlu0 %v3894_v56, %s3778_s29 }
 0x3e5   : > { %v714_v37 = vpop.xlane.xlu0 %713 }
 0x3e6   : > { %3554 = vrcp.f32 %v714_v37  ;;  %v710_v38 = vpop.xlane.xlu1 %709 }
 0x3e7   : > { %3556 = vrcp.f32 %v710_v38  ;;  %1248 = vrot.lane.b32.xlu0 %v3892_v55, %s3778_s29 }
 0x3e8   : > { %v3551_v0 = vpop.eup %3550 }
 0x3e9   : > { %v934_v63 = vpop.permute.xlu0 %933  ;;  %v753_v17 = vmul.f32 %v3551_v0, %v4074_v53 }
 0x3ea   : > { %v932_v61 = vpop.permute.xlu1 %931  ;;  %v978_v14 = vsel %vm473_vm1, %v934_v63, 0 }
 0x3eb   : > { %1252 = vrot.lane.b32.xlu0 %v3900_v1, %s3778_s29  ;;  %3343 = vmatprep.subr.msk.bf16.mxu0 %vm473_vm1, %v932_v61  ;;  %v975_v62 = vsel %vm473_vm1, %v932_v61, 0  ;;  %s3782_s29 = smov 72  }
 0x3ec   : > { %3111 = vmatpush3.bf16.xpose.msra.mxu0 %v975_v62  ;;  %v3553_v4 = vpop.eup %3552 }
 0x3ed   : > { %3344 = vmatprep.subr.msk.bf16.mxu0 %vm473_vm1, %v934_v63  ;;  %v751_v10 = vmul.f32 %v3553_v4, %v4077_v54  ;;  %v936_v19 = vpop.permute.xlu0 %935 }
 0x3ee   : > { %v981_v18 = vsel %vm473_vm1, %v936_v19, 0 }
 0x3f0   : > { %v3555_v5 = vpop.eup %3554 }
 0x3f1   : > { %v3557_v6 = vpop.eup %3556  ;;  %v754_v9 = vmul.f32 %v3555_v5, %v4080_v57 }
 0x3f2   : > { %v752_v13 = vmul.f32 %v3557_v6, %v4082_v58 }
 0x3f3   : > { %v766_v3 = vpack.c.bf16 %v754_v9, %v753_v17 }
 0x3f4   : > { %3113 = vmatpush3.bf16.xpose.msra.mxu0 %v978_v14  ;;  %v765_v20 = vpack.c.bf16 %v752_v13, %v751_v10 }
 0x3f5   : > { %3345 = vmatprep.subr.msk.bf16.mxu0 %vm473_vm1, %v936_v19 }
 0x3f6   : > { %3092 = vmatprep.mubr.bf16.mxu0 %v765_v20 }
 0x3f7   : > { %3093 = vmatmul.mubr.bf16.gmra.mrb[20].mxu0 %v766_v3 }
 0x3fc   : > { %3115 = vmatpush3.bf16.xpose.msra.mxu0 %v981_v18 }
 0x41b   : > { %v726_v53 = vpop.xlane.xlu1 %725 }
 0x41e   : > { %v720_v57 = vpop.xlane.xlu0 %719 }
 0x41f   : > { %v940_v50 = vpop.permute.xlu1 %939 }
 0x420   : > { %v987_v33 = vsel %vm473_vm1, %v940_v50, 0 }
 0x422   : > { %v716_v22 = vpop.xlane.xlu0 %715 }
 0x423   : > { %v918_v38 = vpop.permute.xlu1 %917 }
 0x426   : > { %v722_v54 = vpop.xlane.xlu0 %721 }
 0x427   : > { %3558 = vrcp.f32 %v722_v54  ;;  %v922_v61 = vpop.permute.xlu1 %921 }
 0x428   : > { %3560 = vrcp.f32 %v716_v22 }
 0x429   : > { %3562 = vrcp.f32 %v720_v57 }
 0x42a   : > { %v718_v58 = vpop.xlane.xlu0 %717 }
 0x42b   : > { %3564 = vrcp.f32 %v718_v58 }
 0x42c   : > { %3566 = vrcp.f32 %v726_v53 }
 0x42e   : > { %v728_v23 = vpop.xlane.xlu0 %727 }
 0x431   : > { %v3559_v8 = vpop.eup %3558 }
 0x432   : > { %v724_v12 = vpop.xlane.xlu0 %723  ;;  %v3561_v11 = vpop.eup %3560  ;;  %v758_v32 = vmul.f32 %v3559_v8, %v4109_v25 }
 0x433   : > { %3568 = vrcp.f32 %v724_v12  ;;  %v3563_v26 = vpop.eup %3562  ;;  %v755_v40 = vmul.f32 %v3561_v11, %v4105_v24  ;;  %v2789_v11 = vld [vmem:[%s5186_s5 + $0x90] sm:$0xff] }
 0x434   : > { %3570 = vrcp.f32 %v728_v23  ;;  %v757_v42 = vmul.f32 %v3563_v26, %v4101_v7  ;;  %v2787_v26 = vld [vmem:[%s5186_s5 + $0x80] sm:$0xff] }
 0x435   : > { %v3565_v30 = vpop.eup %3564 }
 0x436   : > { %v730_v39 = vpop.xlane.xlu0 %729  ;;  %v756_v41 = vmul.f32 %v3565_v30, %v4112_v27  ;;  %v768_v44 = vpack.c.bf16 %v758_v32, %v757_v42  ;;  %v3567_v48 = vpop.eup %3566  ;;  %v2790_v42 = vld [vmem:[%s5186_s5 + $0x98] sm:$0xff] }
 0x437   : > { %3572 = vrcp.f32 %v730_v39  ;;  %v760_v7 = vmul.f32 %v3567_v48, %v4097_v21 }
 0x438   : > { %v767_v43 = vpack.c.bf16 %v756_v41, %v755_v40 }
 0x43a   : > { %3096 = vmatprep.mubr.bf16.mxu0 %v767_v43  ;;  %v938_v47 = vpop.permute.xlu0 %937 }
 0x43b   : > { %3097 = vmatmul.mubr.bf16.gmra.mrb[24].mxu0 %v768_v44  ;;  %3346 = vmatprep.subr.msk.bf16.mxu0 %vm473_vm1, %v938_v47  ;;  %v984_v49 = vsel %vm473_vm1, %v938_v47, 0 }
 0x43c   : > { %3117 = vmatpush3.bf16.xpose.msra.mxu0 %v984_v49 }
 0x43d   : > { %v3569_v25 = vpop.eup %3568  ;;  %3347 = vmatprep.subr.msk.bf16.mxu0 %vm473_vm1, %v940_v50 }
 0x43e   : > { %v910_v24 = vpop.permute.xlu0 %909  ;;  %v759_v27 = vmul.f32 %v3569_v25, %v4122_v16  ;;  %v3571_v51 = vpop.eup %3570 }
 0x43f   : > { %v761_v29 = vmul.f32 %v3571_v51, %v4117_v15 }
 0x440   : > { %v769_v52 = vpack.c.bf16 %v760_v7, %v759_v27 }
 0x441   : > { %v3573_v59 = vpop.eup %3572 }
 0x442   : > { %3100 = vmatprep.mubr.bf16.mxu0 %v769_v52  ;;  %v912_v60 = vpop.permute.xlu0 %911  ;;  %v762_v31 = vmul.f32 %v3573_v59, %v4127_v28  ;;  %v1241_v28 = vpop.permute.xlu1 %1240 }
 0x444   : > { %3119 = vmatpush3.bf16.xpose.msra.mxu0 %v987_v33  ;;  %v770_v34 = vpack.c.bf16 %v762_v31, %v761_v29  ;;  %v2788_v29 = vld [vmem:[%s5186_s5 + $0x88] sm:$0xff]  ;;  %v2793_v33 = vld [vmem:[%s5186_s5 + $0xb0] sm:$0xff] }
 0x446   : > { %3101 = vmatmul.mubr.bf16.gmra.mrb[28].mxu0 %v770_v34  ;;  %v914_v37 = vpop.permute.xlu0 %913  ;;  %v1245_v0 = vpop.permute.xlu1 %1244  ;;  %v2794_v34 = vld [vmem:[%s5186_s5 + $0xb8] sm:$0xff] }
 0x447   : > { %3120 = vmatprep.mubr.msk.bf16.mxu0 %vm473_vm1, %v910_v24 }
 0x44a   : > { %v916_v16 = vpop.permute.xlu0 %915  ;;  %v1251_v6 = vpop.permute.xlu1 %1250 }
 0x44e   : > { %3121 = vmatmul.mubr.msk.bf16.vlgmr.msra.gmra.mrb[32].mxu0 %vm473_vm1, %v912_v60  ;;  %v920_v21 = vpop.permute.xlu0 %919 }
 0x44f   : > { %3124 = vmatprep.mubr.msk.bf16.mxu0 %vm473_vm1, %v914_v37 }
 0x452   : > { %v924_v62 = vpop.permute.xlu0 %923 }
 0x456   : > { %3125 = vmatmul.mubr.msk.bf16.gmra.mrb[36].mxu0 %vm473_vm1, %v916_v16  ;;  %v1239_v15 = vpop.permute.xlu0 %1238  ;;  %v2791_v16 = vld [vmem:[%s5186_s5 + $0xa0] sm:$0xff] }
 0x457   : > { %3128 = vmatprep.mubr.msk.bf16.mxu0 %vm473_vm1, %v918_v38  ;;  %3136 = vmatprep.subr.bf16.mxu1 %v1239_v15 }
 0x458   : > { %3137 = vmatpush3.bf16.msra.mxu1 %v1239_v15  ;;  %v2797_v15 = vld [vmem:[%s5186_s5 + $0xd0] sm:$0xff] }
 0x459   : > { %3138 = vmatprep.subr.bf16.mxu1 %v1241_v28 }
 0x45a   : > { %v1243_v63 = vpop.permute.xlu0 %1242 }
 0x45c   : > { %3139 = vmatpush3.bf16.msra.mxu1 %v1241_v28  ;;  %v2798_v28 = vld [vmem:[%s5186_s5 + $0xd8] sm:$0xff] }
 0x45d   : > { %3140 = vmatprep.subr.bf16.mxu1 %v1243_v63 }
 0x45e   : > { %3129 = vmatmul.mubr.msk.bf16.gmra.mrb[40].mxu0 %vm473_vm1, %v920_v21  ;;  %v1247_v4 = vpop.permute.xlu0 %1246  ;;  %v2792_v21 = vld [vmem:[%s5186_s5 + $0xa8] sm:$0xff] }
 0x45f   : > { %3132 = vmatprep.mubr.msk.bf16.mxu0 %vm473_vm1, %v922_v61 }
 0x460   : > { %3141 = vmatpush3.bf16.msra.mxu1 %v1243_v63 }
 0x461   : > { %3142 = vmatprep.subr.bf16.mxu1 %v1245_v0 }
 0x462   : > { %v1249_v5 = vpop.permute.xlu0 %1248 }
 0x464   : > { %3143 = vmatpush3.bf16.msra.mxu1 %v1245_v0  ;;  %v2795_v0 = vld [vmem:[%s5186_s5 + $0xc0] sm:$0xff] }
 0x465   : > { %3144 = vmatprep.subr.bf16.mxu1 %v1247_v4 }
 0x466   : > { %3133 = vmatmul.mubr.msk.bf16.gmra.mrb[44].mxu0 %vm473_vm1, %v924_v62  ;;  %v1253_v9 = vpop.permute.xlu0 %1252 }
 0x468   : > { %3145 = vmatpush3.bf16.msra.mxu1 %v1247_v4 }
 0x469   : > { %3146 = vmatprep.subr.bf16.mxu1 %v1249_v5 }
 0x46c   : > { %3147 = vmatpush3.bf16.msra.mxu1 %v1249_v5  ;;  %v2796_v5 = vld [vmem:[%s5186_s5 + $0xc8] sm:$0xff] }
 0x46d   : > { %3148 = vmatprep.subr.bf16.mxu1 %v1251_v6 }
 0x470   : > { %3149 = vmatpush3.bf16.msra.mxu1 %v1251_v6 }
 0x471   : > { %3150 = vmatprep.subr.bf16.mxu1 %v1253_v9 }
 0x474   : > { %3151 = vmatpush3.bf16.msra.mxu1 %v1253_v9 }
 0x495   : > { %v4202_v10 = vpop.f32.mrb[16].mxu0 }
 0x496   : > { %5188 = vst [vmem:[#allocation2_spill] sm:$0xff] %v4202_v10  ;;  %v4204_v13 = vpop.f32.mrb[17].mxu0 }
 0x497   : > { %5189 = vst [vmem:[#allocation3_spill] sm:$0xff] %v4204_v13  ;;  %v4206_v14 = vpop.f32.mrb[18].mxu0 }
 0x498   : > { %5190 = vst [vmem:[#allocation4_spill] sm:$0xff] %v4206_v14  ;;  %v4208_v17 = vpop.f32.mrb[19].mxu0 }
 0x499   : > { %5191 = vst [vmem:[#allocation5_spill] sm:$0xff] %v4208_v17 }
 0x4ca   : > { %v4210_v19 = vpop.f32.mrb[20].mxu0 }
 0x4cb   : > { %5192 = vst [vmem:[#allocation6_spill] sm:$0xff] %v4210_v19  ;;  %v4212_v20 = vpop.f32.mrb[21].mxu0 }
 0x4cc   : > { %5193 = vst [vmem:[#allocation7_spill] sm:$0xff] %v4212_v20  ;;  %v4214_v3 = vpop.f32.mrb[22].mxu0 }
 0x4cd   : > { %5194 = vst [vmem:[#allocation8_spill] sm:$0xff] %v4214_v3  ;;  %v4216_v18 = vpop.f32.mrb[23].mxu0 }
 0x4ce   : > { %5195 = vst [vmem:[#allocation9_spill] sm:$0xff] %v4216_v18 }
 0x50e   : > { %v4218_v57 = vpop.f32.mrb[24].mxu0 }
 0x50f   : > { %5196 = vst [vmem:[#allocation10_spill] sm:$0xff] %v4218_v57  ;;  %v4220_v22 = vpop.f32.mrb[25].mxu0 }
 0x510   : > { %5197 = vst [vmem:[#allocation11_spill] sm:$0xff] %v4220_v22  ;;  %v4222_v54 = vpop.f32.mrb[26].mxu0 }
 0x511   : > { %5198 = vst [vmem:[#allocation12_spill] sm:$0xff] %v4222_v54  ;;  %v4224_v58 = vpop.f32.mrb[27].mxu0 }
 0x512   : > { %5199 = vst [vmem:[#allocation13_spill] sm:$0xff] %v4224_v58 }
 0x519   : > { %v4226_v53 = vpop.f32.mrb[28].mxu0 }
 0x51a   : > { %5200 = vst [vmem:[#allocation14_spill] sm:$0xff] %v4226_v53  ;;  %v4228_v23 = vpop.f32.mrb[29].mxu0 }
 0x51b   : > { %5201 = vst [vmem:[#allocation15_spill] sm:$0xff] %v4228_v23  ;;  %v4230_v8 = vpop.f32.mrb[30].mxu0 }
 0x51c   : > { %5202 = vst [vmem:[#allocation16_spill] sm:$0xff] %v4230_v8  ;;  %v4232_v12 = vpop.f32.mrb[31].mxu0 }
 0x51d   : > { %5203 = vst [vmem:[#allocation17_spill] sm:$0xff] %v4232_v12 }
 0x521   : > { %v3122_v30 = vpop.f32.mrb[32].mxu0 }
 0x522   : > { %v4240_v32 = vadd.f32 %v3122_v30, %v2789_v11  ;;  %v1023_v39 = vpop.f32.mrb[33].mxu0  ;;  %v2801_v11 = vld [vmem:[%s5186_s5 + $0xf0] sm:$0xff] }
 0x523   : > { %v4242_v40 = vadd.f32 %v2787_v26, %v1023_v39  ;;  %v3123_v41 = vpop.f32.mrb[34].mxu0  ;;  %v2802_v26 = vld [vmem:[%s5186_s5 + $0xf8] sm:$0xff]  ;;  %v2799_v39 = vld [vmem:[%s5186_s5 + $0xe0] sm:$0xff] }
 0x524   : > { %1090 = vmax.xlane.f32.xlu0 %v4240_v32  ;;  %v1026_v43 = vpop.f32.mrb[35].mxu0  ;;  %v4249_v44 = vadd.f32 %v3123_v41, %v2790_v42  ;;  %v2800_v42 = vld [vmem:[%s5186_s5 + $0xe8] sm:$0xff] }
 0x525   : > { %1086 = vmax.xlane.f32.xlu1 %v4242_v40  ;;  %v4259_v31 = vadd.f32 %v2788_v29, %v1026_v43 }
 0x529   : > { %1092 = vmax.xlane.f32.xlu1 %v4249_v44  ;;  %v3126_v47 = vpop.f32.mrb[36].mxu0 }
 0x52a   : > { %v1039_v48 = vpop.f32.mrb[37].mxu0  ;;  %v4268_v37 = vadd.f32 %v3126_v47, %v2793_v33 }
 0x52b   : > { %v3127_v49 = vpop.f32.mrb[38].mxu0  ;;  %v1040_v61 = vadd.f32 %v2791_v16, %v1039_v48 }
 0x52c   : > { %v1042_v50 = vpop.f32.mrb[39].mxu0  ;;  %v4273_v38 = vadd.f32 %v3127_v49, %v2794_v34 }
 0x52d   : > { %v4280_v62 = vadd.f32 %v2792_v21, %v1042_v50 }
 0x531   : > { %v3130_v25 = vpop.f32.mrb[40].mxu0 }
 0x532   : > { %v1055_v24 = vpop.f32.mrb[41].mxu0  ;;  %v4289_v63 = vadd.f32 %v3130_v25, %v2797_v15 }
 0x533   : > { %v3131_v27 = vpop.f32.mrb[42].mxu0  ;;  %v4301_v6 = vadd.f32 %v2795_v0, %v1055_v24 }
 0x534   : > { %v1058_v7 = vpop.f32.mrb[43].mxu0  ;;  %v4294_v4 = vadd.f32 %v3131_v27, %v2798_v28 }
 0x535   : > { %v4303_v9 = vadd.f32 %v2796_v5, %v1058_v7 }
 0x539   : > { %v3134_v51 = vpop.f32.mrb[44].mxu0 }
 0x53a   : > { %1394 = vrot.lane.b32.xlu0 %v3874_v35, %s3779_s11  ;;  %1392 = vrot.lane.b32.xlu1 %v3876_v36, %s3779_s11  ;;  %v1071_v52 = vpop.f32.mrb[45].mxu0  ;;  %v4313_v30 = vadd.f32 %v3134_v51, %v2801_v11 }
 0x53b   : > { %v3135_v59 = vpop.f32.mrb[46].mxu0  ;;  %v4325_v43 = vadd.f32 %v2799_v39, %v1071_v52 }
 0x53c   : > { %v1074_v60 = vpop.f32.mrb[47].mxu0  ;;  %v4318_v41 = vadd.f32 %v3135_v59, %v2802_v26 }
 0x53d   : > { %v4327_v47 = vadd.f32 %v2800_v42, %v1074_v60 }
 0x559   : > { %1088 = vmax.xlane.f32.xlu0 %v4259_v31 }
 0x55d   : > { %1098 = vmax.xlane.f32.xlu0 %v4268_v37 }
 0x55e   : > { %1100 = vmax.xlane.f32.xlu1 %v4273_v38 }
 0x561   : > { %1094 = vmax.xlane.f32.xlu0 %v1040_v61 }
 0x562   : > { %1096 = vmax.xlane.f32.xlu1 %v4280_v62 }
 0x565   : > { %1106 = vmax.xlane.f32.xlu0 %v4289_v63 }
 0x566   : > { %1108 = vmax.xlane.f32.xlu1 %v4294_v4 }
 0x569   : > { %1102 = vmax.xlane.f32.xlu0 %v4301_v6 }
 0x56a   : > { %1104 = vmax.xlane.f32.xlu1 %v4303_v9 }
 0x56d   : > { %1114 = vmax.xlane.f32.xlu0 %v4313_v30 }
 0x56e   : > { %1116 = vmax.xlane.f32.xlu1 %v4318_v41 }
 0x571   : > { %1110 = vmax.xlane.f32.xlu0 %v4325_v43 }
 0x572   : > { %1112 = vmax.xlane.f32.xlu1 %v4327_v47 }
 0x587   : > { %1396 = vrot.lane.b32.xlu0 %v3886_v46, %s3779_s11 }
 0x5b1   : > { %v1091_v48 = vpop.xlane.xlu0 %1090 }
 0x5b2   : > { %v1120_v49 = vsub.f32 %v4240_v32, %v1091_v48  ;;  %v1087_v50 = vpop.xlane.xlu1 %1086 }
 0x5b3   : > { %v1118_v25 = vsub.f32 %v4242_v40, %v1087_v50 }
 0x5b4   : > { %v1138_v24 = vmul.f32 1.442695, %v1120_v49 }
 0x5b5   : > { %v1134_v27 = vmul.f32 1.442695, %v1118_v25 }
 0x5b6   : > { %3574 = vpow2.f32 %v1138_v24  ;;  %v1093_v7 = vpop.xlane.xlu1 %1092 }
 0x5b7   : > { %v1121_v51 = vsub.f32 %v4249_v44, %v1093_v7  ;;  %3576 = vpow2.f32 %v1134_v27  ;;  %v4351_v44 = vpop.permute.xlu0 %1394 }
 0x5b9   : > { %v1140_v52 = vmul.f32 1.442695, %v1121_v51 }
 0x5ba   : > { %v4336_v59 = vpop.permute.xlu1 %1392 }
 0x5bb   : > { %3348 = vmatprep.subr.msk.bf16.mxu1 %vm473_vm1, %v4336_v59  ;;  %3578 = vpow2.f32 %v1140_v52 }
 0x5c0   : > { %v4340_v60 = vpop.eup %3574 }
 0x5c1   : > { %1170 = vadd.xlane.f32.xlu1 %v4340_v60  ;;  %v4343_v32 = vpop.eup %3576 }
 0x5c5   : > { %1166 = vadd.xlane.f32.xlu1 %v4343_v32  ;;  %v4346_v40 = vpop.eup %3578 }
 0x5c9   : > { %1172 = vadd.xlane.f32.xlu1 %v4346_v40 }
 0x5da   : > { %1398 = vrot.lane.b32.xlu1 %v3884_v45, %s3779_s11 }
 0x5e6   : > { %v1089_v29 = vpop.xlane.xlu0 %1088 }
 0x5e7   : > { %v1119_v33 = vsub.f32 %v4259_v31, %v1089_v29 }
 0x5e9   : > { %v1136_v34 = vmul.f32 1.442695, %v1119_v33 }
 0x5ea   : > { %v1099_v16 = vpop.xlane.xlu0 %1098 }
 0x5eb   : > { %3580 = vpow2.f32 %v1136_v34  ;;  %v1101_v21 = vpop.xlane.xlu1 %1100 }
 0x5ec   : > { %v1125_v28 = vsub.f32 %v4273_v38, %v1101_v21 }
 0x5ee   : > { %v1095_v15 = vpop.xlane.xlu0 %1094  ;;  %v1148_v39 = vmul.f32 1.442695, %v1125_v28  ;;  %v1124_v28 = vsub.f32 %v4268_v37, %v1099_v16 }
 0x5ef   : > { %v1122_v0 = vsub.f32 %v1040_v61, %v1095_v15  ;;  %v1097_v5 = vpop.xlane.xlu1 %1096 }
 0x5f1   : > { %v1142_v11 = vmul.f32 1.442695, %v1122_v0 }
 0x5f2   : > { %v1107_v26 = vpop.xlane.xlu0 %1106 }
 0x5f3   : > { %3582 = vpow2.f32 %v1142_v11  ;;  %v1128_v42 = vsub.f32 %v4289_v63, %v1107_v26  ;;  %v1109_v48 = vpop.xlane.xlu1 %1108  ;;  %v1146_v11 = vmul.f32 1.442695, %v1124_v28  ;;  %v1123_v26 = vsub.f32 %v4280_v62, %v1097_v5 }
 0x5f4   : > { %3584 = vpow2.f32 %v1148_v39  ;;  %v1129_v38 = vsub.f32 %v4294_v4, %v1109_v48 }
 0x5f5   : > { %v4356_v49 = vpop.eup %3580  ;;  %v1154_v50 = vmul.f32 1.442695, %v1128_v42  ;;  %v1144_v39 = vmul.f32 1.442695, %v1123_v26 }
 0x5f6   : > { %1168 = vadd.xlane.f32.xlu0 %v4356_v49  ;;  %v1103_v31 = vpop.xlane.xlu0 %1102  ;;  %v1156_v63 = vmul.f32 1.442695, %v1129_v38 }
 0x5f7   : > { %v1126_v25 = vsub.f32 %v4301_v6, %v1103_v31  ;;  %v1105_v24 = vpop.xlane.xlu1 %1104  ;;  %3586 = vpow2.f32 %v1154_v50 }
 0x5f8   : > { %v1127_v51 = vsub.f32 %v4303_v9, %v1105_v24 }
 0x5f9   : > { %v1150_v61 = vmul.f32 1.442695, %v1126_v25 }
 0x5fa   : > { %v1152_v6 = vmul.f32 1.442695, %v1127_v51  ;;  %v1115_v0 = vpop.xlane.xlu0 %1114 }
 0x5fb   : > { %v1117_v27 = vpop.xlane.xlu1 %1116  ;;  %3588 = vpow2.f32 %v1150_v61  ;;  %v1132_v42 = vsub.f32 %v4313_v30, %v1115_v0 }
 0x5fc   : > { %3590 = vpow2.f32 %v1156_v63  ;;  %v1133_v25 = vsub.f32 %v4318_v41, %v1117_v27 }
 0x5fd   : > { %v4361_v7 = vpop.eup %3582  ;;  %3592 = vpow2.f32 %v1152_v6  ;;  %v1162_v31 = vmul.f32 1.442695, %v1132_v42 }
 0x5fe   : > { %1174 = vadd.xlane.f32.xlu1 %v4361_v7  ;;  %v4365_v29 = vpop.eup %3584  ;;  %v1111_v48 = vpop.xlane.xlu0 %1110  ;;  %v1164_v62 = vmul.f32 1.442695, %v1133_v25 }
 0x5ff   : > { %v1113_v52 = vpop.xlane.xlu1 %1112  ;;  %v1130_v50 = vsub.f32 %v4325_v43, %v1111_v48 }
 0x600   : > { %v1131_v33 = vsub.f32 %v4327_v47, %v1113_v52 }
 0x601   : > { %v4369_v4 = vpop.eup %3586  ;;  %v1158_v37 = vmul.f32 1.442695, %v1130_v50  ;;  %v1433_v50 = vsel %vm473_vm1, %v4336_v59, 0 }
 0x602   : > { %1180 = vadd.xlane.f32.xlu1 %v4365_v29  ;;  %v1160_v34 = vmul.f32 1.442695, %v1131_v33  ;;  %v1397_v27 = vpop.permute.xlu0 %1396 }
 0x604   : > { %3594 = vpow2.f32 %v1160_v34 }
 0x605   : > { %v4372_v21 = vpop.eup %3588  ;;  %3596 = vpow2.f32 %v1146_v11 }
 0x606   : > { %1186 = vadd.xlane.f32.xlu1 %v4369_v4  ;;  %v4377_v9 = vpop.eup %3590  ;;  %3598 = vpow2.f32 %v1144_v39 }
 0x607   : > { %v4380_v15 = vpop.eup %3592  ;;  %3600 = vpow2.f32 %v1162_v31 }
 0x608   : > { %3602 = vpow2.f32 %v1158_v37 }
 0x609   : > { %3604 = vpow2.f32 %v1164_v62 }
 0x60a   : > { %1182 = vadd.xlane.f32.xlu1 %v4372_v21 }
 0x60c   : > { %1400 = vrot.lane.b32.xlu0 %v3894_v56, %s3779_s11 }
 0x60e   : > { %1188 = vadd.xlane.f32.xlu1 %v4377_v9  ;;  %v4383_v47 = vpop.eup %3594 }
 0x60f   : > { %v4393_v16 = vpop.eup %3596 }
 0x610   : > { %v4397_v30 = vpop.eup %3598 }
 0x611   : > { %v4401_v43 = vpop.eup %3600 }
 0x612   : > { %1184 = vadd.xlane.f32.xlu1 %v4380_v15  ;;  %v4405_v41 = vpop.eup %3602 }
 0x613   : > { %v4409_v5 = vpop.eup %3604 }
 0x616   : > { %1192 = vadd.xlane.f32.xlu1 %v4383_v47 }
 0x627   : > { %1402 = vrot.lane.b32.xlu1 %v3892_v55, %s3779_s11 }
 0x62b   : > { %1178 = vadd.xlane.f32.xlu0 %v4393_v16  ;;  %1376 = vrot.lane.b32.xlu1 %v3876_v36, %s3780_s18 }
 0x62f   : > { %1176 = vadd.xlane.f32.xlu0 %v4397_v30  ;;  %1380 = vrot.lane.b32.xlu1 %v3886_v46, %s3780_s18 }
 0x633   : > { %1384 = vrot.lane.b32.xlu1 %v3894_v56, %s3780_s18  ;;  %1194 = vadd.xlane.f32.xlu0 %v4401_v43 }
 0x637   : > { %1388 = vrot.lane.b32.xlu1 %v3902_v2, %s3780_s18  ;;  %1190 = vadd.xlane.f32.xlu0 %v4405_v41 }
 0x63b   : > { %1707 = vrot.lane.b32.xlu1 %v3874_v35, %s3781_s19  ;;  %1196 = vadd.xlane.f32.xlu0 %v4409_v5 }
 0x63f   : > { %1711 = vrot.lane.b32.xlu1 %v3884_v45, %s3781_s19 }
 0x643   : > { %1717 = vrot.lane.b32.xlu1 %v3902_v2, %s3781_s19 }
 0x64e   : > { %v1171_v24 = vpop.xlane.xlu1 %1170 }
 0x651   : > { %1404 = vrot.lane.b32.xlu0 %v3902_v2, %s3779_s11 }
 0x652   : > { %v1167_v38 = vpop.xlane.xlu1 %1166 }
 0x655   : > { %1406 = vrot.lane.b32.xlu0 %v3900_v1, %s3779_s11 }
 0x656   : > { %v1173_v61 = vpop.xlane.xlu1 %1172 }
 0x657   : > { %3606 = vrcp.f32 %v1173_v61 }
 0x658   : > { %3608 = vrcp.f32 %v1167_v38 }
 0x659   : > { %1378 = vrot.lane.b32.xlu0 %v3874_v35, %s3780_s18  ;;  %3610 = vrcp.f32 %v1171_v24 }
 0x65a   : > { %v1399_v51 = vpop.permute.xlu1 %1398 }
 0x65b   : > { %v1442_v59 = vsel %vm473_vm1, %v1399_v51, 0 }
 0x65d   : > { %1382 = vrot.lane.b32.xlu0 %v3884_v45, %s3780_s18 }
 0x661   : > { %1386 = vrot.lane.b32.xlu0 %v3892_v55, %s3780_s18  ;;  %v3607_v52 = vpop.eup %3606 }
 0x662   : > { %v3609_v33 = vpop.eup %3608  ;;  %v1217_v0 = vmul.f32 %v3607_v52, %v4346_v40 }
 0x663   : > { %v3611_v34 = vpop.eup %3610  ;;  %v1214_v11 = vmul.f32 %v3609_v33, %v4343_v32  ;;  %v1436_v32 = vsel %vm473_vm1, %v4351_v44, 0 }
 0x664   : > { %v1216_v39 = vmul.f32 %v3611_v34, %v4340_v60 }
 0x665   : > { %1390 = vrot.lane.b32.xlu0 %v3900_v1, %s3780_s18 }
 0x666   : > { %v1231_v31 = vpack.c.bf16 %v1217_v0, %v1216_v39 }
 0x669   : > { %1705 = vrot.lane.b32.xlu0 %v3876_v36, %s3781_s19 }
 0x66d   : > { %1709 = vrot.lane.b32.xlu0 %v3886_v46, %s3781_s19 }
 0x671   : > { %1713 = vrot.lane.b32.xlu0 %v3894_v56, %s3781_s19 }
 0x675   : > { %1715 = vrot.lane.b32.xlu0 %v3892_v55, %s3781_s19 }
 0x679   : > { %1719 = vrot.lane.b32.xlu0 %v3900_v1, %s3781_s19 }
 0x683   : > { %v1169_v63 = vpop.xlane.xlu0 %1168 }
 0x684   : > { %3612 = vrcp.f32 %v1169_v63 }
 0x687   : > { %v1401_v62 = vpop.permute.xlu0 %1400 }
 0x68b   : > { %v1175_v6 = vpop.xlane.xlu1 %1174 }
 0x68c   : > { %3614 = vrcp.f32 %v1175_v6 }
 0x68e   : > { %v3613_v28 = vpop.eup %3612 }
 0x68f   : > { %v1215_v26 = vmul.f32 %v3613_v28, %v4356_v49  ;;  %v1181_v42 = vpop.xlane.xlu1 %1180  ;;  %v1439_v49 = vsel %vm473_vm1, %v1397_v27, 0 }
 0x690   : > { %3616 = vrcp.f32 %v1181_v42 }
 0x691   : > { %v1230_v48 = vpack.c.bf16 %v1215_v26, %v1214_v11 }
 0x693   : > { %3152 = vmatprep.mubr.bf16.mxu1 %v1230_v48  ;;  %v1187_v25 = vpop.xlane.xlu1 %1186 }
 0x694   : > { %3153 = vmatmul.mubr.bf16.vlgmr.msra.gmra.mrb[16].mxu1 %v1231_v31 }
 0x695   : > { %3169 = vmatpush3.bf16.xpose.msra.mxu1 %v1433_v50 }
 0x696   : > { %3349 = vmatprep.subr.msk.bf16.mxu1 %vm473_vm1, %v4351_v44  ;;  %v1445_v44 = vsel %vm473_vm1, %v1401_v62, 0  ;;  %v3615_v52 = vpop.eup %3614 }
 0x697   : > { %v1183_v40 = vpop.xlane.xlu1 %1182  ;;  %v1218_v42 = vmul.f32 %v3615_v52, %v4361_v7 }
 0x69a   : > { %v3617_v33 = vpop.eup %3616 }
 0x69b   : > { %v1189_v60 = vpop.xlane.xlu1 %1188  ;;  %v1221_v50 = vmul.f32 %v3617_v33, %v4365_v29 }
 0x69d   : > { %3171 = vmatpush3.bf16.xpose.msra.mxu1 %v1436_v32 }
 0x69e   : > { %3350 = vmatprep.subr.msk.bf16.mxu1 %vm473_vm1, %v1397_v27 }
 0x69f   : > { %v1185_v37 = vpop.xlane.xlu1 %1184 }
 0x6a3   : > { %v1193_v24 = vpop.xlane.xlu1 %1192 }
 0x6a5   : > { %3173 = vmatpush3.bf16.xpose.msra.mxu1 %v1439_v49 }
 0x6a6   : > { %3351 = vmatprep.subr.msk.bf16.mxu1 %vm473_vm1, %v1399_v51 }
 0x6a7   : > { %v1403_v38 = vpop.permute.xlu1 %1402 }
 0x6a8   : > { %v1448_v27 = vsel %vm473_vm1, %v1403_v38, 0 }
 0x6ad   : > { %3175 = vmatpush3.bf16.xpose.msra.mxu1 %v1442_v59 }
 0x6ae   : > { %3352 = vmatprep.subr.msk.bf16.mxu1 %vm473_vm1, %v1401_v62 }
 0x6b5   : > { %3177 = vmatpush3.bf16.xpose.msra.mxu1 %v1445_v44 }
 0x6b6   : > { %3353 = vmatprep.subr.msk.bf16.mxu1 %vm473_vm1, %v1403_v38 }
 0x6b8   : > { %v1179_v61 = vpop.xlane.xlu0 %1178 }
 0x6b9   : > { %3618 = vrcp.f32 %v1179_v61 }
 0x6ba   : > { %3620 = vrcp.f32 %v1185_v37 }
 0x6bb   : > { %3622 = vrcp.f32 %v1183_v40 }
 0x6bc   : > { %v1177_v63 = vpop.xlane.xlu0 %1176 }
 0x6bd   : > { %3179 = vmatpush3.bf16.xpose.msra.mxu1 %v1448_v27  ;;  %3624 = vrcp.f32 %v1177_v63 }
 0x6be   : > { %3626 = vrcp.f32 %v1189_v60 }
 0x6bf   : > { %3628 = vrcp.f32 %v1187_v25 }
 0x6c0   : > { %v1195_v51 = vpop.xlane.xlu0 %1194  ;;  %3630 = vrcp.f32 %v1193_v24 }
 0x6c3   : > { %v3619_v34 = vpop.eup %3618 }
 0x6c4   : > { %v1191_v28 = vpop.xlane.xlu0 %1190  ;;  %v3621_v0 = vpop.eup %3620  ;;  %v1220_v26 = vmul.f32 %v3619_v34, %v4393_v16 }
 0x6c5   : > { %3632 = vrcp.f32 %v1191_v28  ;;  %v3623_v6 = vpop.eup %3622  ;;  %v1223_v31 = vmul.f32 %v3621_v0, %v4380_v15  ;;  %v1377_v15 = vpop.permute.xlu1 %1376 }
 0x6c6   : > { %v1222_v32 = vmul.f32 %v3623_v6, %v4372_v21  ;;  %v1233_v40 = vpack.c.bf16 %v1221_v50, %v1220_v26 }
 0x6c7   : > { %v3625_v11 = vpop.eup %3624 }
 0x6c8   : > { %v1197_v39 = vpop.xlane.xlu0 %1196  ;;  %v1219_v48 = vmul.f32 %v3625_v11, %v4397_v30  ;;  %v3627_v60 = vpop.eup %3626  ;;  %v1234_v37 = vpack.c.bf16 %v1223_v31, %v1222_v32 }
 0x6c9   : > { %3634 = vrcp.f32 %v1197_v39  ;;  %v3629_v16 = vpop.eup %3628  ;;  %v1225_v59 = vmul.f32 %v3627_v60, %v4377_v9  ;;  %v1381_v27 = vpop.permute.xlu1 %1380 }
 0x6ca   : > { %v1232_v25 = vpack.c.bf16 %v1219_v48, %v1218_v42  ;;  %3636 = vrcp.f32 %v1195_v51  ;;  %v3631_v30 = vpop.eup %3630  ;;  %v1224_v24 = vmul.f32 %v3629_v16, %v4369_v4 }
 0x6cb   : > { %v1227_v44 = vmul.f32 %v3631_v30, %v4383_v47  ;;  %v2818_v30 = vld [vmem:[%s5186_s5 + $0x138] sm:$0xff] }
 0x6cc   : > { %3156 = vmatprep.mubr.bf16.mxu1 %v1232_v25  ;;  %v1405_v49 = vpop.permute.xlu0 %1404  ;;  %v1235_v38 = vpack.c.bf16 %v1225_v59, %v1224_v24  ;;  %v2817_v24 = vld [vmem:[%s5186_s5 + $0x130] sm:$0xff] }
 0x6cd   : > { %3157 = vmatmul.mubr.bf16.gmra.mrb[20].mxu1 %v1233_v40  ;;  %3354 = vmatprep.subr.msk.bf16.mxu1 %vm473_vm1, %v1405_v49  ;;  %v1451_v7 = vsel %vm473_vm1, %v1405_v49, 0  ;;  %v1385_v28 = vpop.permute.xlu1 %1384 }
 0x6ce   : > { %3160 = vmatprep.mubr.bf16.mxu1 %v1234_v37  ;;  %3181 = vmatpush3.bf16.xpose.msra.mxu1 %v1451_v7 }
 0x6cf   : > { %v3633_v29 = vpop.eup %3632 }
 0x6d0   : > { %v1407_v21 = vpop.permute.xlu0 %1406  ;;  %v1226_v62 = vmul.f32 %v3633_v29, %v4405_v41 }
 0x6d1   : > { %3355 = vmatprep.subr.msk.bf16.mxu1 %vm473_vm1, %v1407_v21  ;;  %v1454_v52 = vsel %vm473_vm1, %v1407_v21, 0  ;;  %v1389_v47 = vpop.permute.xlu1 %1388 }
 0x6d2   : > { %v1236_v51 = vpack.c.bf16 %v1227_v44, %v1226_v62 }
 0x6d3   : > { %v3635_v61 = vpop.eup %3634 }
 0x6d4   : > { %v1379_v63 = vpop.permute.xlu0 %1378  ;;  %v3637_v33 = vpop.eup %3636  ;;  %v1229_v9 = vmul.f32 %v3635_v61, %v4409_v5 }
 0x6d5   : > { %3161 = vmatmul.mubr.bf16.gmra.mrb[24].mxu1 %v1235_v38  ;;  %v1228_v34 = vmul.f32 %v3637_v33, %v4401_v43  ;;  %v1708_v26 = vpop.permute.xlu1 %1707  ;;  %v2812_v33 = vld [vmem:[%s5186_s5 + $0x108] sm:$0xff]  ;;  %v2815_v38 = vld [vmem:[%s5186_s5 + $0x120] sm:$0xff] }
 0x6d6   : > { %3164 = vmatprep.mubr.bf16.mxu1 %v1236_v51  ;;  %3183 = vmatpush3.bf16.xpose.msra.mxu1 %v1454_v52 }
 0x6d7   : > { %v1237_v4 = vpack.c.bf16 %v1229_v9, %v1228_v34  ;;  %v2813_v9 = vld [vmem:[%s5186_s5 + $0x110] sm:$0xff] }
 0x6d8   : > { %v1383_v41 = vpop.permute.xlu0 %1382 }
 0x6d9   : > { %v1712_v43 = vpop.permute.xlu1 %1711 }
 0x6dc   : > { %v1387_v0 = vpop.permute.xlu0 %1386 }
 0x6dd   : > { %3165 = vmatmul.mubr.bf16.gmra.mrb[28].mxu1 %v1237_v4  ;;  %v1718_v48 = vpop.permute.xlu1 %1717 }
 0x6de   : > { %3184 = vmatprep.mubr.msk.bf16.mxu1 %vm473_vm1, %v1377_v15 }
 0x6e0   : > { %v1391_v6 = vpop.permute.xlu0 %1390 }
 0x6e4   : > { %v1706_v11 = vpop.permute.xlu0 %1705 }
 0x6e5   : > { %3185 = vmatmul.mubr.msk.bf16.vlgmr.msra.gmra.mrb[32].mxu1 %vm473_vm1, %v1379_v63  ;;  %3200 = vmatprep.subr.bf16.mxu0 %v1706_v11 }
 0x6e6   : > { %3188 = vmatprep.mubr.msk.bf16.mxu1 %vm473_vm1, %v1381_v27  ;;  %3201 = vmatpush3.bf16.msra.mxu0 %v1706_v11 }
 0x6e7   : > { %3202 = vmatprep.subr.bf16.mxu0 %v1708_v26 }
 0x6e8   : > { %v1710_v5 = vpop.permute.xlu0 %1709 }
 0x6ea   : > { %3203 = vmatpush3.bf16.msra.mxu0 %v1708_v26 }
 0x6eb   : > { %3204 = vmatprep.subr.bf16.mxu0 %v1710_v5 }
 0x6ec   : > { %v1714_v39 = vpop.permute.xlu0 %1713 }
 0x6ed   : > { %3189 = vmatmul.mubr.msk.bf16.gmra.mrb[36].mxu1 %vm473_vm1, %v1383_v41  ;;  %v2811_v41 = vld [vmem:[%s5186_s5 + $0x100] sm:$0xff] }
 0x6ee   : > { %3192 = vmatprep.mubr.msk.bf16.mxu1 %vm473_vm1, %v1385_v28  ;;  %3205 = vmatpush3.bf16.msra.mxu0 %v1710_v5 }
 0x6ef   : > { %3206 = vmatprep.subr.bf16.mxu0 %v1712_v43 }
 0x6f0   : > { %v1716_v42 = vpop.permute.xlu0 %1715 }
 0x6f2   : > { %3207 = vmatpush3.bf16.msra.mxu0 %v1712_v43 }
 0x6f3   : > { %3208 = vmatprep.subr.bf16.mxu0 %v1714_v39 }
 0x6f4   : > { %v1720_v31 = vpop.permute.xlu0 %1719 }
 0x6f5   : > { %3193 = vmatmul.mubr.msk.bf16.gmra.mrb[40].mxu1 %vm473_vm1, %v1387_v0 }
 0x6f6   : > { %3196 = vmatprep.mubr.msk.bf16.mxu1 %vm473_vm1, %v1389_v47  ;;  %3209 = vmatpush3.bf16.msra.mxu0 %v1714_v39 }
 0x6f7   : > { %3210 = vmatprep.subr.bf16.mxu0 %v1716_v42 }
 0x6fa   : > { %3211 = vmatpush3.bf16.msra.mxu0 %v1716_v42 }
 0x6fb   : > { %3212 = vmatprep.subr.bf16.mxu0 %v1718_v48 }
 0x6fd   : > { %3197 = vmatmul.mubr.msk.bf16.gmra.mrb[44].mxu1 %vm473_vm1, %v1391_v6  ;;  %v2814_v6 = vld [vmem:[%s5186_s5 + $0x118] sm:$0xff] }
 0x6fe   : > { %3213 = vmatpush3.bf16.msra.mxu0 %v1718_v48 }
 0x6ff   : > { %3214 = vmatprep.subr.bf16.mxu0 %v1720_v31 }
 0x702   : > { %3215 = vmatpush3.bf16.msra.mxu0 %v1720_v31 }
 0x767   : > { %v4470_v50 = vpop.f32.mrb[16].mxu1 }
 0x768   : > { %v4472_v25 = vpop.f32.mrb[17].mxu1 }
 0x769   : > { %v4474_v32 = vpop.f32.mrb[18].mxu1 }
 0x76a   : > { %v4478_v60 = vpop.f32.mrb[19].mxu1 }
 0x7a0   : > { %v4482_v37 = vpop.f32.mrb[20].mxu1 }
 0x7a1   : > { %v4484_v16 = vpop.f32.mrb[21].mxu1 }
 0x7a2   : > { %v4486_v7 = vpop.f32.mrb[22].mxu1 }
 0x7a3   : > { %v4490_v15 = vpop.f32.mrb[23].mxu1 }
 0x7a8   : > { %v4494_v59 = vpop.f32.mrb[24].mxu1 }
 0x7a9   : > { %v4496_v21 = vpop.f32.mrb[25].mxu1 }
 0x7aa   : > { %v4498_v62 = vpop.f32.mrb[26].mxu1 }
 0x7ab   : > { %v4502_v44 = vpop.f32.mrb[27].mxu1 }
 0x7b0   : > { %v4506_v61 = vpop.f32.mrb[28].mxu1 }
 0x7b1   : > { %v4508_v27 = vpop.f32.mrb[29].mxu1 }
 0x7b2   : > { %v4510_v63 = vpop.f32.mrb[30].mxu1 }
 0x7b3   : > { %v4514_v52 = vpop.f32.mrb[31].mxu1 }
 0x7b8   : > { %v3186_v34 = vpop.f32.mrb[32].mxu1 }
 0x7b9   : > { %v4524_v28 = vadd.f32 %v3186_v34, %v2813_v9  ;;  %v1490_v4 = vpop.f32.mrb[33].mxu1 }
 0x7ba   : > { %v4526_v0 = vadd.f32 %v2811_v41, %v1490_v4  ;;  %v3187_v47 = vpop.f32.mrb[34].mxu1 }
 0x7bb   : > { %1557 = vmax.xlane.f32.xlu0 %v4524_v28  ;;  %v1493_v11 = vpop.f32.mrb[35].mxu1  ;;  %v4533_v26 = vadd.f32 %v3187_v47, %v2814_v6 }
 0x7bc   : > { %1553 = vmax.xlane.f32.xlu1 %v4526_v0  ;;  %v4543_v51 = vadd.f32 %v2812_v33, %v1493_v11  ;;  %v2816_v33 = vld [vmem:[%s5186_s5 + $0x128] sm:$0xff] }
 0x7c0   : > { %1559 = vmax.xlane.f32.xlu1 %v4533_v26  ;;  %v3190_v5 = vpop.f32.mrb[36].mxu1 }
 0x7c1   : > { %v1506_v43 = vpop.f32.mrb[37].mxu1  ;;  %v4552_v49 = vadd.f32 %v3190_v5, %v2817_v24  ;;  %v2821_v24 = vld [vmem:[%s5186_s5 + $0x150] sm:$0xff] }
 0x7c2   : > { %v3191_v39 = vpop.f32.mrb[38].mxu1  ;;  %v1507_v11 = vadd.f32 %v2815_v38, %v1506_v43  ;;  %v2820_v43 = vld [vmem:[%s5186_s5 + $0x148] sm:$0xff] }
 0x7c3   : > { %v1509_v42 = vpop.f32.mrb[39].mxu1  ;;  %v4557_v29 = vadd.f32 %v3191_v39, %v2818_v30  ;;  %v2822_v30 = vld [vmem:[%s5186_s5 + $0x158] sm:$0xff]  ;;  %v2819_v39 = vld [vmem:[%s5186_s5 + $0x140] sm:$0xff] }
 0x7c4   : > { %v4564_v40 = vadd.f32 %v2816_v33, %v1509_v42 }
 0x7c8   : > { %v3194_v48 = vpop.f32.mrb[40].mxu1 }
 0x7c9   : > { %v1522_v31 = vpop.f32.mrb[41].mxu1  ;;  %v4573_v5 = vadd.f32 %v3194_v48, %v2821_v24  ;;  %v2825_v48 = vld [vmem:[%s5186_s5 + $0x170] sm:$0xff] }
 0x7ca   : > { %v3195_v9 = vpop.f32.mrb[42].mxu1  ;;  %v4585_v42 = vadd.f32 %v2819_v39, %v1522_v31  ;;  %v2823_v31 = vld [vmem:[%s5186_s5 + $0x160] sm:$0xff] }
 0x7cb   : > { %v1525_v41 = vpop.f32.mrb[43].mxu1  ;;  %v4578_v38 = vadd.f32 %v3195_v9, %v2822_v30  ;;  %v2826_v9 = vld [vmem:[%s5186_s5 + $0x178] sm:$0xff]  ;;  %v2824_v30 = vld [vmem:[%s5186_s5 + $0x168] sm:$0xff] }
 0x7cc   : > { %v4587_v33 = vadd.f32 %v2820_v43, %v1525_v41 }
 0x7d0   : > { %v3198_v34 = vpop.f32.mrb[44].mxu1 }
 0x7d1   : > { %1861 = vrot.lane.b32.xlu0 %v3874_v35, %s3782_s29  ;;  %1859 = vrot.lane.b32.xlu1 %v3876_v36, %s3782_s29  ;;  %v1538_v4 = vpop.f32.mrb[45].mxu1  ;;  %v4597_v24 = vadd.f32 %v3198_v34, %v2825_v48 }
 0x7d2   : > { %v3199_v47 = vpop.f32.mrb[46].mxu1  ;;  %v4609_v39 = vadd.f32 %v2823_v31, %v1538_v4 }
 0x7d3   : > { %v1541_v6 = vpop.f32.mrb[47].mxu1  ;;  %v4602_v41 = vadd.f32 %v3199_v47, %v2826_v9 }
 0x7d4   : > { %v4611_v43 = vadd.f32 %v2824_v30, %v1541_v6 }
 0x7f0   : > { %1555 = vmax.xlane.f32.xlu0 %v4543_v51 }
 0x7f4   : > { %1565 = vmax.xlane.f32.xlu0 %v4552_v49 }
 0x7f5   : > { %1567 = vmax.xlane.f32.xlu1 %v4557_v29 }
 0x7f8   : > { %1561 = vmax.xlane.f32.xlu0 %v1507_v11 }
 0x7f9   : > { %1563 = vmax.xlane.f32.xlu1 %v4564_v40 }
 0x7fc   : > { %1573 = vmax.xlane.f32.xlu0 %v4573_v5 }
 0x7fd   : > { %1575 = vmax.xlane.f32.xlu1 %v4578_v38 }
 0x800   : > { %1569 = vmax.xlane.f32.xlu0 %v4585_v42 }
 0x801   : > { %1571 = vmax.xlane.f32.xlu1 %v4587_v33 }
 0x804   : > { %1581 = vmax.xlane.f32.xlu0 %v4597_v24 }
 0x805   : > { %1583 = vmax.xlane.f32.xlu1 %v4602_v41 }
 0x808   : > { %1577 = vmax.xlane.f32.xlu0 %v4609_v39 }
 0x809   : > { %1579 = vmax.xlane.f32.xlu1 %v4611_v43 }
 0x81e   : > { %1863 = vrot.lane.b32.xlu0 %v3886_v46, %s3782_s29 }
 0x848   : > { %v1558_v34 = vpop.xlane.xlu0 %1557 }
 0x849   : > { %v1587_v47 = vsub.f32 %v4524_v28, %v1558_v34  ;;  %v1554_v48 = vpop.xlane.xlu1 %1553 }
 0x84a   : > { %v1585_v9 = vsub.f32 %v4526_v0, %v1554_v48 }
 0x84b   : > { %v1605_v23 = vmul.f32 1.442695, %v1587_v47 }
 0x84c   : > { %v1601_v12 = vmul.f32 1.442695, %v1585_v9 }
 0x84d   : > { %3638 = vpow2.f32 %v1605_v23  ;;  %v1560_v4 = vpop.xlane.xlu1 %1559 }
 0x84e   : > { %v1588_v6 = vsub.f32 %v4533_v26, %v1560_v4  ;;  %3640 = vpow2.f32 %v1601_v12  ;;  %v4635_v12 = vpop.permute.xlu0 %1861 }
 0x850   : > { %v1607_v31 = vmul.f32 1.442695, %v1588_v6 }
 0x851   : > { %v4620_v30 = vpop.permute.xlu1 %1859 }
 0x852   : > { %3356 = vmatprep.subr.msk.bf16.mxu0 %vm473_vm1, %v4620_v30  ;;  %3642 = vpow2.f32 %v1607_v31 }
 0x857   : > { %v4624_v53 = vpop.eup %3638 }
 0x858   : > { %1637 = vadd.xlane.f32.xlu1 %v4624_v53  ;;  %v4627_v28 = vpop.eup %3640 }
 0x85c   : > { %1633 = vadd.xlane.f32.xlu1 %v4627_v28  ;;  %v4630_v23 = vpop.eup %3642 }
 0x860   : > { %1639 = vadd.xlane.f32.xlu1 %v4630_v23 }
 0x871   : > { %1865 = vrot.lane.b32.xlu1 %v3884_v45, %s3782_s29 }
 0x87d   : > { %v1556_v0 = vpop.xlane.xlu0 %1555 }
 0x87e   : > { %v1586_v26 = vsub.f32 %v4543_v51, %v1556_v0 }
 0x880   : > { %v1603_v34 = vmul.f32 1.442695, %v1586_v26 }
 0x881   : > { %v1566_v47 = vpop.xlane.xlu0 %1565 }
 0x882   : > { %3644 = vpow2.f32 %v1603_v34  ;;  %v1568_v48 = vpop.xlane.xlu1 %1567 }
 0x883   : > { %v1592_v4 = vsub.f32 %v4557_v29, %v1568_v48 }
 0x885   : > { %v1562_v9 = vpop.xlane.xlu0 %1561  ;;  %v1615_v54 = vmul.f32 1.442695, %v1592_v4 }
 0x886   : > { %v1589_v6 = vsub.f32 %v1507_v11, %v1562_v9  ;;  %v1564_v31 = vpop.xlane.xlu1 %1563 }
 0x888   : > { %v1609_v8 = vmul.f32 1.442695, %v1589_v6 }
 0x889   : > { %v1574_v57 = vpop.xlane.xlu0 %1573 }
 0x88a   : > { %3646 = vpow2.f32 %v1609_v8  ;;  %v1595_v22 = vsub.f32 %v4573_v5, %v1574_v57  ;;  %v1576_v58 = vpop.xlane.xlu1 %1575 }
 0x88b   : > { %3648 = vpow2.f32 %v1615_v54  ;;  %v1596_v29 = vsub.f32 %v4578_v38, %v1576_v58 }
 0x88c   : > { %v4640_v19 = vpop.eup %3644  ;;  %v1621_v0 = vmul.f32 1.442695, %v1595_v22 }
 0x88d   : > { %1635 = vadd.xlane.f32.xlu0 %v4640_v19  ;;  %v1570_v51 = vpop.xlane.xlu0 %1569  ;;  %v1623_v57 = vmul.f32 1.442695, %v1596_v29 }
 0x88e   : > { %v1593_v26 = vsub.f32 %v4585_v42, %v1570_v51  ;;  %v1572_v34 = vpop.xlane.xlu1 %1571  ;;  %3650 = vpow2.f32 %v1621_v0  ;;  %v1591_v51 = vsub.f32 %v4552_v49, %v1566_v47 }
 0x88f   : > { %v1594_v8 = vsub.f32 %v4587_v33, %v1572_v34  ;;  %v1590_v34 = vsub.f32 %v4564_v40, %v1564_v31 }
 0x890   : > { %v1617_v11 = vmul.f32 1.442695, %v1593_v26  ;;  %v1613_v26 = vmul.f32 1.442695, %v1591_v51 }
 0x891   : > { %v1619_v22 = vmul.f32 1.442695, %v1594_v8  ;;  %v1582_v0 = vpop.xlane.xlu0 %1581  ;;  %v1611_v29 = vmul.f32 1.442695, %v1590_v34 }
 0x892   : > { %v1584_v48 = vpop.xlane.xlu1 %1583  ;;  %3652 = vpow2.f32 %v1617_v11  ;;  %v1599_v11 = vsub.f32 %v4597_v24, %v1582_v0 }
 0x893   : > { %3654 = vpow2.f32 %v1623_v57 }
 0x894   : > { %v4645_v9 = vpop.eup %3646  ;;  %3656 = vpow2.f32 %v1619_v22  ;;  %v1629_v8 = vmul.f32 1.442695, %v1599_v11  ;;  %v1600_v22 = vsub.f32 %v4602_v41, %v1584_v48 }
 0x895   : > { %1641 = vadd.xlane.f32.xlu1 %v4645_v9  ;;  %v4649_v4 = vpop.eup %3648  ;;  %v1578_v57 = vpop.xlane.xlu0 %1577 }
 0x896   : > { %v1580_v5 = vpop.xlane.xlu1 %1579  ;;  %v1631_v40 = vmul.f32 1.442695, %v1600_v22 }
 0x897   : > { %v1598_v54 = vsub.f32 %v4611_v43, %v1580_v5  ;;  %v1597_v5 = vsub.f32 %v4609_v39, %v1578_v57 }
 0x898   : > { %v4653_v58 = vpop.eup %3650 }
 0x899   : > { %1647 = vadd.xlane.f32.xlu1 %v4649_v4  ;;  %v1627_v38 = vmul.f32 1.442695, %v1598_v54  ;;  %v1625_v49 = vmul.f32 1.442695, %v1597_v5  ;;  %v1864_v51 = vpop.permute.xlu0 %1863 }
 0x89b   : > { %3658 = vpow2.f32 %v1627_v38 }
 0x89c   : > { %v4656_v42 = vpop.eup %3652  ;;  %3660 = vpow2.f32 %v1613_v26 }
 0x89d   : > { %1653 = vadd.xlane.f32.xlu1 %v4653_v58  ;;  %v4661_v33 = vpop.eup %3654  ;;  %3662 = vpow2.f32 %v1611_v29 }
 0x89e   : > { %v4664_v6 = vpop.eup %3656  ;;  %3664 = vpow2.f32 %v1629_v8 }
 0x89f   : > { %3666 = vpow2.f32 %v1625_v49 }
 0x8a0   : > { %3668 = vpow2.f32 %v1631_v40 }
 0x8a1   : > { %1649 = vadd.xlane.f32.xlu1 %v4656_v42 }
 0x8a3   : > { %1867 = vrot.lane.b32.xlu0 %v3894_v56, %s3782_s29 }
 0x8a5   : > { %1655 = vadd.xlane.f32.xlu1 %v4661_v33  ;;  %v4667_v43 = vpop.eup %3658 }
 0x8a6   : > { %v4677_v47 = vpop.eup %3660 }
 0x8a7   : > { %v4681_v24 = vpop.eup %3662 }
 0x8a8   : > { %v4685_v39 = vpop.eup %3664 }
 0x8a9   : > { %1651 = vadd.xlane.f32.xlu1 %v4664_v6  ;;  %v4689_v41 = vpop.eup %3666 }
 0x8aa   : > { %v4693_v31 = vpop.eup %3668 }
 0x8ad   : > { %1659 = vadd.xlane.f32.xlu1 %v4667_v43 }
 0x8be   : > { %1869 = vrot.lane.b32.xlu1 %v3892_v55, %s3782_s29 }
 0x8c2   : > { %1645 = vadd.xlane.f32.xlu0 %v4677_v47  ;;  %1843 = vrot.lane.b32.xlu1 %v3876_v36, %s3783_s12 }
 0x8c6   : > { %1643 = vadd.xlane.f32.xlu0 %v4681_v24  ;;  %1847 = vrot.lane.b32.xlu1 %v3886_v46, %s3783_s12 }
 0x8ca   : > { %1851 = vrot.lane.b32.xlu1 %v3894_v56, %s3783_s12  ;;  %1661 = vadd.xlane.f32.xlu0 %v4685_v39 }
 0x8ce   : > { %1855 = vrot.lane.b32.xlu1 %v3902_v2, %s3783_s12  ;;  %1657 = vadd.xlane.f32.xlu0 %v4689_v41 }
 0x8d2   : > { %2174 = vrot.lane.b32.xlu1 %v3874_v35, %s3784_s13  ;;  %1663 = vadd.xlane.f32.xlu0 %v4693_v31 }
 0x8e5   : > { %v1638_v48 = vpop.xlane.xlu1 %1637 }
 0x8e8   : > { %1871 = vrot.lane.b32.xlu0 %v3902_v2, %s3782_s29 }
 0x8e9   : > { %v1634_v54 = vpop.xlane.xlu1 %1633 }
 0x8ec   : > { %1873 = vrot.lane.b32.xlu0 %v3900_v1, %s3782_s29 }
 0x8ed   : > { %v1640_v38 = vpop.xlane.xlu1 %1639 }
 0x8ee   : > { %3670 = vrcp.f32 %v1640_v38 }
 0x8ef   : > { %3672 = vrcp.f32 %v1634_v54 }
 0x8f0   : > { %1845 = vrot.lane.b32.xlu0 %v3874_v35, %s3783_s12  ;;  %3674 = vrcp.f32 %v1638_v48  ;;  %v1900_v48 = vsel %vm473_vm1, %v4620_v30, 0 }
 0x8f1   : > { %v1866_v26 = vpop.permute.xlu1 %1865 }
 0x8f2   : > { %v1909_v30 = vsel %vm473_vm1, %v1866_v26, 0 }
 0x8f4   : > { %1849 = vrot.lane.b32.xlu0 %v3884_v45, %s3783_s12 }
 0x8f8   : > { %1853 = vrot.lane.b32.xlu0 %v3892_v55, %s3783_s12  ;;  %v3671_v35 = vpop.eup %3670 }
 0x8f9   : > { %v3673_v29 = vpop.eup %3672  ;;  %v1684_v8 = vmul.f32 %v3671_v35, %v4630_v23 }
 0x8fa   : > { %v3675_v11 = vpop.eup %3674  ;;  %v1681_v5 = vmul.f32 %v3673_v29, %v4627_v28  ;;  %v1903_v28 = vsel %vm473_vm1, %v4635_v12, 0 }
 0x8fb   : > { %v1683_v22 = vmul.f32 %v3675_v11, %v4624_v53  ;;  %v1906_v53 = vsel %vm473_vm1, %v1864_v51, 0 }
 0x8fc   : > { %1857 = vrot.lane.b32.xlu0 %v3900_v1, %s3783_s12 }
 0x8fd   : > { %v1698_v54 = vpack.c.bf16 %v1684_v8, %v1683_v22 }
 0x900   : > { %2172 = vrot.lane.b32.xlu0 %v3876_v36, %s3784_s13 }
 0x91a   : > { %v1636_v0 = vpop.xlane.xlu0 %1635 }
 0x91b   : > { %3676 = vrcp.f32 %v1636_v0 }
 0x91e   : > { %v1868_v35 = vpop.permute.xlu0 %1867 }
 0x922   : > { %v1642_v34 = vpop.xlane.xlu1 %1641 }
 0x923   : > { %3678 = vrcp.f32 %v1642_v34 }
 0x925   : > { %v3677_v57 = vpop.eup %3676 }
 0x926   : > { %v1682_v36 = vmul.f32 %v3677_v57, %v4640_v19  ;;  %v1648_v49 = vpop.xlane.xlu1 %1647 }
 0x927   : > { %3680 = vrcp.f32 %v1648_v49 }
 0x928   : > { %v1697_v40 = vpack.c.bf16 %v1682_v36, %v1681_v5 }
 0x92a   : > { %3216 = vmatprep.mubr.bf16.mxu0 %v1697_v40  ;;  %v1654_v38 = vpop.xlane.xlu1 %1653 }
 0x92b   : > { %3217 = vmatmul.mubr.bf16.vlgmr.msra.gmra.mrb[48].mxu0 %v1698_v54 }
 0x92c   : > { %3233 = vmatpush3.bf16.xpose.msra.mxu0 %v1900_v48 }
 0x92d   : > { %3357 = vmatprep.subr.msk.bf16.mxu0 %vm473_vm1, %v4635_v12  ;;  %v1912_v12 = vsel %vm473_vm1, %v1868_v35, 0  ;;  %v3679_v5 = vpop.eup %3678 }
 0x92e   : > { %v1650_v23 = vpop.xlane.xlu1 %1649 }
 0x931   : > { %v3681_v36 = vpop.eup %3680 }
 0x932   : > { %v1656_v19 = vpop.xlane.xlu1 %1655 }
 0x934   : > { %3235 = vmatpush3.bf16.xpose.msra.mxu0 %v1903_v28 }
 0x935   : > { %3358 = vmatprep.subr.msk.bf16.mxu0 %vm473_vm1, %v1864_v51 }
 0x936   : > { %v1652_v0 = vpop.xlane.xlu1 %1651 }
 0x93a   : > { %v1660_v29 = vpop.xlane.xlu1 %1659 }
 0x93c   : > { %3237 = vmatpush3.bf16.xpose.msra.mxu0 %v1906_v53 }
 0x93d   : > { %3359 = vmatprep.subr.msk.bf16.mxu0 %vm473_vm1, %v1866_v26 }
 0x93e   : > { %v1870_v11 = vpop.permute.xlu1 %1869 }
 0x93f   : > { %v1915_v51 = vsel %vm473_vm1, %v1870_v11, 0 }
 0x944   : > { %3239 = vmatpush3.bf16.xpose.msra.mxu0 %v1909_v30 }
 0x945   : > { %3360 = vmatprep.subr.msk.bf16.mxu0 %vm473_vm1, %v1868_v35 }
 0x94c   : > { %3241 = vmatpush3.bf16.xpose.msra.mxu0 %v1912_v12 }
 0x94d   : > { %3361 = vmatprep.subr.msk.bf16.mxu0 %vm473_vm1, %v1870_v11 }
 0x94f   : > { %v1646_v57 = vpop.xlane.xlu0 %1645 }
 0x950   : > { %3682 = vrcp.f32 %v1646_v57 }
 0x951   : > { %3684 = vrcp.f32 %v1652_v0 }
 0x952   : > { %3686 = vrcp.f32 %v1650_v23  ;;  %v1685_v23 = vmul.f32 %v3679_v5, %v4645_v9 }
 0x953   : > { %v1644_v26 = vpop.xlane.xlu0 %1643 }
 0x954   : > { %3243 = vmatpush3.bf16.xpose.msra.mxu0 %v1915_v51  ;;  %3688 = vrcp.f32 %v1644_v26 }
 0x955   : > { %3690 = vrcp.f32 %v1656_v19  ;;  %v1688_v19 = vmul.f32 %v3681_v36, %v4649_v4 }
 0x956   : > { %3692 = vrcp.f32 %v1654_v38 }
 0x957   : > { %v1662_v8 = vpop.xlane.xlu0 %1661  ;;  %3694 = vrcp.f32 %v1660_v29 }
 0x95a   : > { %v3683_v22 = vpop.eup %3682 }
 0x95b   : > { %v1658_v40 = vpop.xlane.xlu0 %1657  ;;  %v3685_v54 = vpop.eup %3684  ;;  %v1687_v48 = vmul.f32 %v3683_v22, %v4677_v47 }
 0x95c   : > { %3696 = vrcp.f32 %v1658_v40  ;;  %v3687_v34 = vpop.eup %3686  ;;  %v1690_v0 = vmul.f32 %v3685_v54, %v4664_v6  ;;  %v1844_v6 = vpop.permute.xlu1 %1843 }
 0x95d   : > { %v1689_v30 = vmul.f32 %v3687_v34, %v4656_v42  ;;  %v1700_v35 = vpack.c.bf16 %v1688_v19, %v1687_v48 }
 0x95e   : > { %v3689_v49 = vpop.eup %3688 }
 0x95f   : > { %v1664_v28 = vpop.xlane.xlu0 %1663  ;;  %v1686_v53 = vmul.f32 %v3689_v49, %v4681_v24  ;;  %v3691_v29 = vpop.eup %3690  ;;  %v1701_v11 = vpack.c.bf16 %v1690_v0, %v1689_v30 }
 0x960   : > { %3698 = vrcp.f32 %v1664_v28  ;;  %v3693_v47 = vpop.eup %3692  ;;  %v1692_v24 = vmul.f32 %v3691_v29, %v4661_v33  ;;  %v1848_v54 = vpop.permute.xlu1 %1847 }
 0x961   : > { %v1699_v38 = vpack.c.bf16 %v1686_v53, %v1685_v23  ;;  %3700 = vrcp.f32 %v1662_v8  ;;  %v3695_v9 = vpop.eup %3694  ;;  %v1691_v26 = vmul.f32 %v3693_v47, %v4653_v58 }
 0x962   : > { %v1694_v8 = vmul.f32 %v3695_v9, %v4667_v43 }
 0x963   : > { %3220 = vmatprep.mubr.bf16.mxu0 %v1699_v38  ;;  %v1872_v12 = vpop.permute.xlu0 %1871  ;;  %v1702_v5 = vpack.c.bf16 %v1692_v24, %v1691_v26 }
 0x964   : > { %v1918_v57 = vsel %vm473_vm1, %v1872_v12, 0  ;;  %3221 = vmatmul.mubr.bf16.gmra.mrb[52].mxu0 %v1700_v35  ;;  %3362 = vmatprep.subr.msk.bf16.mxu0 %vm473_vm1, %v1872_v12  ;;  %v1852_v28 = vpop.permute.xlu1 %1851 }
 0x965   : > { %3224 = vmatprep.mubr.bf16.mxu0 %v1701_v11  ;;  %3245 = vmatpush3.bf16.xpose.msra.mxu0 %v1918_v57 }
 0x966   : > { %v3697_v4 = vpop.eup %3696 }
 0x967   : > { %v1874_v42 = vpop.permute.xlu0 %1873  ;;  %v1693_v51 = vmul.f32 %v3697_v4, %v4689_v41 }
 0x968   : > { %3363 = vmatprep.subr.msk.bf16.mxu0 %vm473_vm1, %v1874_v42  ;;  %v1921_v34 = vsel %vm473_vm1, %v1874_v42, 0  ;;  %v1856_v53 = vpop.permute.xlu1 %1855 }
 0x969   : > { %v1703_v40 = vpack.c.bf16 %v1694_v8, %v1693_v51  ;;  %v2840_v8 = vld [vmem:[%s5186_s5 + $0x1a8] sm:$0xff] }
 0x96a   : > { %v3699_v36 = vpop.eup %3698 }
 0x96b   : > { %v1846_v22 = vpop.permute.xlu0 %1845  ;;  %v3701_v49 = vpop.eup %3700  ;;  %v1696_v33 = vmul.f32 %v3699_v36, %v4693_v31 }
 0x96c   : > { %3225 = vmatmul.mubr.bf16.gmra.mrb[56].mxu0 %v1702_v5  ;;  %v1695_v48 = vmul.f32 %v3701_v49, %v4685_v39  ;;  %v2175_v19 = vpop.permute.xlu1 %2174  ;;  %v2837_v49 = vld [vmem:[%s5186_s5 + $0x190] sm:$0xff] }
 0x96d   : > { %3228 = vmatprep.mubr.bf16.mxu0 %v1703_v40  ;;  %3247 = vmatpush3.bf16.xpose.msra.mxu0 %v1921_v34 }
 0x96e   : > { %v1704_v58 = vpack.c.bf16 %v1696_v33, %v1695_v48  ;;  %v2835_v33 = vld [vmem:[%s5186_s5 + $0x180] sm:$0xff] }
 0x96f   : > { %v1850_v41 = vpop.permute.xlu0 %1849 }
 0x973   : > { %v1854_v23 = vpop.permute.xlu0 %1853 }
 0x974   : > { %3229 = vmatmul.mubr.bf16.gmra.mrb[60].mxu0 %v1704_v58  ;;  %v2836_v58 = vld [vmem:[%s5186_s5 + $0x188] sm:$0xff] }
 0x975   : > { %3248 = vmatprep.mubr.msk.bf16.mxu0 %vm473_vm1, %v1844_v6 }
 0x977   : > { %v1858_v43 = vpop.permute.xlu0 %1857 }
 0x97b   : > { %v2173_v0 = vpop.permute.xlu0 %2172 }
 0x97c   : > { %3249 = vmatmul.mubr.msk.bf16.vlgmr.msra.gmra.mrb[64].mxu0 %vm473_vm1, %v1846_v22  ;;  %3264 = vmatprep.subr.bf16.mxu0 %v2173_v0 }
 0x97d   : > { %3316 = vmatprep.subr.bf16.mxu1 %v2173_v0  ;;  %3252 = vmatprep.mubr.msk.bf16.mxu0 %vm473_vm1, %v1848_v54 }
 0x97e   : > { %3265 = vmatpush3.bf16.msra.mxu0 %v2173_v0  ;;  %3324 = vmatpush3.bf16.msra.mxu1 %v2173_v0 }
 0x97f   : > { %3266 = vmatprep.subr.bf16.mxu0 %v2175_v19  ;;  %3317 = vmatprep.subr.bf16.mxu1 %v2175_v19 }
 0x982   : > { %3267 = vmatpush3.bf16.msra.mxu0 %v2175_v19  ;;  %3325 = vmatpush3.bf16.msra.mxu1 %v2175_v19 }
 0x984   : > { %3253 = vmatmul.mubr.msk.bf16.gmra.mrb[68].mxu0 %vm473_vm1, %v1850_v41 }
 0x985   : > { %3256 = vmatprep.mubr.msk.bf16.mxu0 %vm473_vm1, %v1852_v28 }
 0x98c   : > { %3257 = vmatmul.mubr.msk.bf16.gmra.mrb[72].mxu0 %vm473_vm1, %v1854_v23 }
 0x98d   : > { %3260 = vmatprep.mubr.msk.bf16.mxu0 %vm473_vm1, %v1856_v53  ;;  %v2838_v53 = vld [vmem:[%s5186_s5 + $0x198] sm:$0xff] }
 0x994   : > { %3261 = vmatmul.mubr.msk.bf16.gmra.mrb[76].mxu0 %vm473_vm1, %v1858_v43 }
 0x9fe   : > { %v4750_v39 = vpop.f32.mrb[48].mxu0 }
 0x9ff   : > { %v4752_v31 = vpop.f32.mrb[49].mxu0 }
 0xa00   : > { %v4754_v38 = vpop.f32.mrb[50].mxu0 }
 0xa01   : > { %v4758_v35 = vpop.f32.mrb[51].mxu0 }
 0xa37   : > { %v4762_v12 = vpop.f32.mrb[52].mxu0 }
 0xa38   : > { %v4764_v11 = vpop.f32.mrb[53].mxu0 }
 0xa39   : > { %v4766_v47 = vpop.f32.mrb[54].mxu0 }
 0xa3a   : > { %v4770_v9 = vpop.f32.mrb[55].mxu0 }
 0xa3f   : > { %v4774_v6 = vpop.f32.mrb[56].mxu0 }
 0xa40   : > { %v4776_v24 = vpop.f32.mrb[57].mxu0 }
 0xa41   : > { %v4778_v42 = vpop.f32.mrb[58].mxu0 }
 0xa42   : > { %v4782_v26 = vpop.f32.mrb[59].mxu0 }
 0xa47   : > { %v4786_v5 = vpop.f32.mrb[60].mxu0 }
 0xa48   : > { %v4788_v36 = vpop.f32.mrb[61].mxu0 }
 0xa49   : > { %v4790_v22 = vpop.f32.mrb[62].mxu0 }
 0xa4a   : > { %v4794_v54 = vpop.f32.mrb[63].mxu0 }
 0xa4f   : > { %v3250_v41 = vpop.f32.mrb[64].mxu0 }
 0xa50   : > { %v4804_v48 = vadd.f32 %v3250_v41, %v2837_v49  ;;  %v1957_v28 = vpop.f32.mrb[65].mxu0  ;;  %v2841_v41 = vld [vmem:[%s5186_s5 + $0x1b0] sm:$0xff] }
 0xa51   : > { %v4809_v23 = vadd.f32 %v2835_v33, %v1957_v28  ;;  %v3251_v43 = vpop.f32.mrb[66].mxu0  ;;  %v2842_v28 = vld [vmem:[%s5186_s5 + $0x1b8] sm:$0xff] }
 0xa52   : > { %2024 = vmax.xlane.f32.xlu0 %v4804_v48  ;;  %v1960_v0 = vpop.f32.mrb[67].mxu0  ;;  %v4818_v49 = vadd.f32 %v3251_v43, %v2838_v53  ;;  %v2839_v43 = vld [vmem:[%s5186_s5 + $0x1a0] sm:$0xff] }
 0xa53   : > { %v4815_v19 = vadd.f32 %v2836_v58, %v1960_v0  ;;  %2020 = vmax.xlane.f32.xlu1 %v4809_v23 }
 0xa56   : > { %2022 = vmax.xlane.f32.xlu0 %v4815_v19 }
 0xa57   : > { %2026 = vmax.xlane.f32.xlu1 %v4818_v49  ;;  %v3254_v33 = vpop.f32.mrb[68].mxu0 }
 0xa58   : > { %v4828_v34 = vadd.f32 %v3254_v33, %v2841_v41  ;;  %v1973_v58 = vpop.f32.mrb[69].mxu0  ;;  %v2845_v41 = vld [vmem:[%s5186_s5 + $0x1d0] sm:$0xff] }
 0xa59   : > { %v3255_v53 = vpop.f32.mrb[70].mxu0  ;;  %v4839_v51 = vadd.f32 %v2839_v43, %v1973_v58  ;;  %v2843_v43 = vld [vmem:[%s5186_s5 + $0x1c0] sm:$0xff] }
 0xa5a   : > { %v4833_v0 = vadd.f32 %v3255_v53, %v2842_v28  ;;  %2032 = vmax.xlane.f32.xlu0 %v4828_v34  ;;  %v1976_v40 = vpop.f32.mrb[71].mxu0  ;;  %v2846_v53 = vld [vmem:[%s5186_s5 + $0x1d8] sm:$0xff] }
 0xa5b   : > { %v4845_v33 = vadd.f32 %v2840_v8, %v1976_v40  ;;  %v2844_v40 = vld [vmem:[%s5186_s5 + $0x1c8] sm:$0xff] }
 0xa5c   : > { %2034 = vmax.xlane.f32.xlu1 %v4833_v0 }
 0xa5e   : > { %2028 = vmax.xlane.f32.xlu0 %v4839_v51 }
 0xa5f   : > { %v3258_v28 = vpop.f32.mrb[72].mxu0 }
 0xa60   : > { %v4851_v57 = vadd.f32 %v3258_v28, %v2845_v41  ;;  %2030 = vmax.xlane.f32.xlu1 %v4845_v33  ;;  %v1989_v58 = vpop.f32.mrb[73].mxu0  ;;  %v2849_v41 = vld [vmem:[%s5186_s5 + $0x1f0] sm:$0xff] }
 0xa61   : > { %v3259_v30 = vpop.f32.mrb[74].mxu0  ;;  %v4863_v29 = vadd.f32 %v2843_v43, %v1989_v58  ;;  %v2847_v58 = vld [vmem:[%s5186_s5 + $0x1e0] sm:$0xff] }
 0xa62   : > { %v4857_v4 = vadd.f32 %v3259_v30, %v2846_v53  ;;  %2040 = vmax.xlane.f32.xlu0 %v4851_v57  ;;  %v1992_v8 = vpop.f32.mrb[75].mxu0 }
 0xa63   : > { %v4869_v28 = vadd.f32 %v2844_v40, %v1992_v8  ;;  %v2850_v8 = vld [vmem:[%s5186_s5 + $0x1f8] sm:$0xff]  ;;  %v2848_v40 = vld [vmem:[%s5186_s5 + $0x1e8] sm:$0xff] }
 0xa64   : > { %2042 = vmax.xlane.f32.xlu1 %v4857_v4 }
 0xa66   : > { %2036 = vmax.xlane.f32.xlu0 %v4863_v29 }
 0xa67   : > { %v3262_v30 = vpop.f32.mrb[76].mxu0 }
 0xa68   : > { %v4872_v53 = vadd.f32 %v3262_v30, %v2849_v41  ;;  %2038 = vmax.xlane.f32.xlu1 %v4869_v28  ;;  %v2005_v3 = vpop.f32.mrb[77].mxu0 }
 0xa69   : > { %v3263_v43 = vpop.f32.mrb[78].mxu0  ;;  %v4879_v20 = vadd.f32 %v2847_v58, %v2005_v3 }
 0xa6a   : > { %2048 = vmax.xlane.f32.xlu0 %v4872_v53  ;;  %v2008_v18 = vpop.f32.mrb[79].mxu0  ;;  %v4893_v3 = vadd.f32 %v3263_v43, %v2850_v8 }
 0xa6e   : > { %2044 = vmax.xlane.f32.xlu0 %v4879_v20 }
 0xa79   : > { %2180 = vrot.lane.b32.xlu1 %v3894_v56, %s3784_s13  ;;  %v4899_v56 = vadd.f32 %v2848_v40, %v2008_v18 }
 0xa84   : > { %2176 = vrot.lane.b32.xlu0 %v3886_v46, %s3784_s13 }
 0xa88   : > { %2178 = vrot.lane.b32.xlu0 %v3884_v45, %s3784_s13 }
 0xa8c   : > { %2184 = vrot.lane.b32.xlu0 %v3902_v2, %s3784_s13 }
 0xa9d   : > { %2050 = vmax.xlane.f32.xlu1 %v4893_v3 }
 0xaa1   : > { %2046 = vmax.xlane.f32.xlu1 %v4899_v56 }
 0xab2   : > { %2182 = vrot.lane.b32.xlu1 %v3892_v55, %s3784_s13 }
 0xadf   : > { %v2025_v45 = vpop.xlane.xlu0 %2024 }
 0xae0   : > { %v2054_v46 = vsub.f32 %v4804_v48, %v2025_v45  ;;  %v2021_v2 = vpop.xlane.xlu1 %2020 }
 0xae1   : > { %v2052_v41 = vsub.f32 %v4809_v23, %v2021_v2 }
 0xae2   : > { %v2072_v30 = vmul.f32 1.442695, %v2054_v46 }
 0xae3   : > { %v2023_v58 = vpop.xlane.xlu0 %2022  ;;  %v2068_v43 = vmul.f32 1.442695, %v2052_v41 }
 0xae4   : > { %3702 = vpow2.f32 %v2072_v30  ;;  %v2027_v8 = vpop.xlane.xlu1 %2026  ;;  %v2053_v18 = vsub.f32 %v4815_v19, %v2023_v58 }
 0xae5   : > { %v2055_v13 = vsub.f32 %v4818_v49, %v2027_v8  ;;  %3704 = vpow2.f32 %v2068_v43 }
 0xae6   : > { %v2070_v48 = vmul.f32 1.442695, %v2053_v18 }
 0xae7   : > { %v2074_v40 = vmul.f32 1.442695, %v2055_v13  ;;  %v2033_v17 = vpop.xlane.xlu0 %2032 }
 0xae8   : > { %v2058_v55 = vsub.f32 %v4828_v34, %v2033_v17 }
 0xae9   : > { %v2035_v10 = vpop.xlane.xlu1 %2034  ;;  %3706 = vpow2.f32 %v2074_v40 }
 0xaea   : > { %v2080_v14 = vmul.f32 1.442695, %v2058_v55  ;;  %v2059_v23 = vsub.f32 %v4833_v0, %v2035_v10 }
 0xaeb   : > { %v2029_v45 = vpop.xlane.xlu0 %2028 }
 0xaec   : > { %3708 = vpow2.f32 %v2080_v14  ;;  %v2056_v46 = vsub.f32 %v4839_v51, %v2029_v45  ;;  %v2082_v19 = vmul.f32 1.442695, %v2059_v23 }
 0xaed   : > { %v2031_v2 = vpop.xlane.xlu1 %2030  ;;  %3710 = vpow2.f32 %v2070_v48 }
 0xaee   : > { %v4911_v41 = vpop.eup %3702  ;;  %v2076_v49 = vmul.f32 1.442695, %v2056_v46  ;;  %v2057_v13 = vsub.f32 %v4845_v33, %v2031_v2 }
 0xaef   : > { %2104 = vadd.xlane.f32.xlu1 %v4911_v41  ;;  %v2041_v17 = vpop.xlane.xlu0 %2040  ;;  %v4916_v0 = vpop.eup %3704 }
 0xaf0   : > { %3712 = vpow2.f32 %v2076_v49  ;;  %v2078_v34 = vmul.f32 1.442695, %v2057_v13  ;;  %v2062_v30 = vsub.f32 %v4851_v57, %v2041_v17 }
 0xaf1   : > { %v2043_v10 = vpop.xlane.xlu1 %2042  ;;  %3714 = vpow2.f32 %v2082_v19 }
 0xaf2   : > { %3716 = vpow2.f32 %v2078_v34  ;;  %v2088_v51 = vmul.f32 1.442695, %v2062_v30  ;;  %v2063_v57 = vsub.f32 %v4857_v4, %v2043_v10 }
 0xaf3   : > { %2100 = vadd.xlane.f32.xlu1 %v4916_v0  ;;  %v2037_v14 = vpop.xlane.xlu0 %2036  ;;  %v4920_v58 = vpop.eup %3706 }
 0xaf4   : > { %v2060_v33 = vsub.f32 %v4863_v29, %v2037_v14  ;;  %3718 = vpow2.f32 %v2088_v51 }
 0xaf5   : > { %v2039_v43 = vpop.xlane.xlu1 %2038 }
 0xaf6   : > { %v4922_v8 = vpop.eup %3708  ;;  %v2061_v18 = vsub.f32 %v4869_v28, %v2039_v43  ;;  %v2084_v55 = vmul.f32 1.442695, %v2060_v33  ;;  %v2090_v28 = vmul.f32 1.442695, %v2063_v57  ;;  %v5204_v43 = vpack.i.bf16 %v4474_v32, %v4470_v50 }
 0xaf7   : > { %2106 = vadd.xlane.f32.xlu1 %v4920_v58  ;;  %2112 = vadd.xlane.f32.xlu0 %v4922_v8  ;;  %v2049_v40 = vpop.xlane.xlu0 %2048  ;;  %v4929_v29 = vpop.eup %3710 }
 0xaf8   : > { %v2086_v48 = vmul.f32 1.442695, %v2061_v18  ;;  %v2066_v23 = vsub.f32 %v4872_v53, %v2049_v40  ;;  %v5205_v18 = vpack.i.bf16 %v4758_v35, %v4752_v31  ;;  %v5206_v40 = vpack.i.bf16 %v4490_v15, %v4484_v16 }
 0xaf9   : > { %v2181_v30 = vpop.permute.xlu1 %2180  ;;  %v5208_v31 = vpack.i.bf16 %v4502_v44, %v4496_v21  ;;  %v5209_v21 = vpack.i.bf16 %v4478_v60, %v4472_v25  ;;  %v5210_v44 = vpack.i.bf16 %v4754_v38, %v4750_v39  ;;  %v5213_v25 = vpack.i.bf16 %v4498_v62, %v4494_v59 }
 0xafa   : > { %v4931_v45 = vpop.eup %3712  ;;  %3720 = vpow2.f32 %v2086_v48  ;;  %v2096_v46 = vmul.f32 1.442695, %v2066_v23 }
 0xafb   : > { %2102 = vadd.xlane.f32.xlu1 %v4929_v29  ;;  %2108 = vadd.xlane.f32.xlu0 %v4931_v45  ;;  %v2045_v4 = vpop.xlane.xlu0 %2044  ;;  %3722 = vpow2.f32 %v2084_v55  ;;  %v4936_v49 = vpop.eup %3714 }
 0xafc   : > { %v2064_v2 = vsub.f32 %v4879_v20, %v2045_v4  ;;  %v4938_v13 = vpop.eup %3716  ;;  %3724 = vpow2.f32 %v2096_v46 }
 0xafd   : > { %3726 = vpow2.f32 %v2090_v28 }
 0xafe   : > { %v2092_v53 = vmul.f32 1.442695, %v2064_v2  ;;  %v4942_v17 = vpop.eup %3718 }
 0xaff   : > { %2110 = vadd.xlane.f32.xlu1 %v4938_v13  ;;  %2114 = vadd.xlane.f32.xlu0 %v4936_v49  ;;  %v2177_v19 = vpop.permute.xlu0 %2176 }
 0xb00   : > { %3268 = vmatprep.subr.bf16.mxu0 %v2177_v19  ;;  %3318 = vmatprep.subr.bf16.mxu1 %v2177_v19  ;;  %3728 = vpow2.f32 %v2092_v53 }
 0xb01   : > { %3269 = vmatpush3.bf16.msra.mxu0 %v2177_v19  ;;  %3326 = vmatpush3.bf16.msra.mxu1 %v2177_v19 }
 0xb03   : > { %2120 = vadd.xlane.f32.xlu0 %v4942_v17  ;;  %v2179_v20 = vpop.permute.xlu0 %2178 }
 0xb04   : > { %v4945_v34 = vpop.eup %3720  ;;  %3270 = vmatprep.subr.bf16.mxu0 %v2179_v20  ;;  %3319 = vmatprep.subr.bf16.mxu1 %v2179_v20 }
 0xb05   : > { %2118 = vadd.xlane.f32.xlu1 %v4945_v34  ;;  %3271 = vmatpush3.bf16.msra.mxu0 %v2179_v20  ;;  %v4948_v10 = vpop.eup %3722 }
 0xb06   : > { %3327 = vmatpush3.bf16.msra.mxu1 %v2179_v20  ;;  %3272 = vmatprep.subr.bf16.mxu0 %v2181_v30  ;;  %v4951_v14 = vpop.eup %3724 }
 0xb07   : > { %3320 = vmatprep.subr.bf16.mxu1 %v2181_v30  ;;  %2116 = vadd.xlane.f32.xlu0 %v4948_v10  ;;  %v4954_v51 = vpop.eup %3726  ;;  %v2185_v16 = vpop.permute.xlu0 %2184 }
 0xb09   : > { %2128 = vadd.xlane.f32.xlu1 %v4951_v14  ;;  %3273 = vmatpush3.bf16.msra.mxu0 %v2181_v30 }
 0xb0a   : > { %3328 = vmatpush3.bf16.msra.mxu1 %v2181_v30  ;;  %v4957_v33 = vpop.eup %3728 }
 0xb0b   : > { %2122 = vadd.xlane.f32.xlu0 %v4954_v51 }
 0xb0d   : > { %2124 = vadd.xlane.f32.xlu1 %v4957_v33 }
 0xb1e   : > { %2186 = vrot.lane.b32.xlu1 %v3900_v1, %s3784_s13  ;;  %v5207_v1 = vpack.i.bf16 %v4770_v9, %v4764_v11  ;;  %v5211_v9 = vpack.i.bf16 %v4486_v7, %v4482_v37 }
 0xb22   : > { %3392 = vrot.lane.b32.xlu1 %v5204_v43, %s3785_s27 }
 0xb26   : > { %3397 = vrot.lane.b32.xlu1 %v5205_v18, %s3786_s20 }
 0xb2a   : > { %v2051_v57 = vpop.xlane.xlu1 %2050  ;;  %3407 = vrot.lane.b32.xlu1 %v5206_v40, %s3785_s27 }
 0xb2b   : > { %v2067_v50 = vsub.f32 %v4893_v3, %v2051_v57  ;;  %v5212_v3 = vpack.i.bf16 %v4766_v47, %v4762_v12 }
 0xb2d   : > { %v2098_v35 = vmul.f32 1.442695, %v2067_v50 }
 0xb2e   : > { %v2047_v55 = vpop.xlane.xlu1 %2046  ;;  %3417 = vrot.lane.b32.xlu1 %v5207_v1, %s3786_s20 }
 0xb2f   : > { %v2065_v32 = vsub.f32 %v4899_v56, %v2047_v55 }
 0xb31   : > { %v2094_v48 = vmul.f32 1.442695, %v2065_v32 }
 0xb32   : > { %v2183_v23 = vpop.permute.xlu1 %2182  ;;  %3427 = vrot.lane.b32.xlu1 %v5208_v31, %s3785_s27 }
 0xb33   : > { %3730 = vpow2.f32 %v2094_v48  ;;  %3274 = vmatprep.subr.bf16.mxu0 %v2183_v23  ;;  %3321 = vmatprep.subr.bf16.mxu1 %v2183_v23 }
 0xb34   : > { %3275 = vmatpush3.bf16.msra.mxu0 %v2183_v23  ;;  %3329 = vmatpush3.bf16.msra.mxu1 %v2183_v23  ;;  %3732 = vpow2.f32 %v2098_v35 }
 0xb35   : > { %3276 = vmatprep.subr.bf16.mxu0 %v2185_v16  ;;  %3322 = vmatprep.subr.bf16.mxu1 %v2185_v16 }
 0xb38   : > { %3277 = vmatpush3.bf16.msra.mxu0 %v2185_v16  ;;  %3330 = vmatpush3.bf16.msra.mxu1 %v2185_v16 }
 0xb3d   : > { %v4984_v15 = vpop.eup %3730 }
 0xb3e   : > { %2126 = vadd.xlane.f32.xlu0 %v4984_v15  ;;  %v4987_v11 = vpop.eup %3732 }
 0xb42   : > { %2130 = vadd.xlane.f32.xlu0 %v4987_v11 }
 0xb58   : > { %3387 = vrot.lane.b32.xlu0 %v5209_v21, %s3785_s27 }
 0xb5c   : > { %3402 = vrot.lane.b32.xlu0 %v5210_v44, %s3786_s20 }
 0xb60   : > { %3412 = vrot.lane.b32.xlu0 %v5211_v9, %s3785_s27 }
 0xb64   : > { %3422 = vrot.lane.b32.xlu0 %v5212_v3, %s3786_s20 }
 0xb68   : > { %3432 = vrot.lane.b32.xlu0 %v5213_v25, %s3785_s27 }
 0xb7c   : > { %v2105_v60 = vpop.xlane.xlu1 %2104 }
 0xb80   : > { %v2101_v56 = vpop.xlane.xlu1 %2100 }
 0xb81   : > { %3734 = vrcp.f32 %v2101_v56 }
 0xb84   : > { %v2107_v46 = vpop.xlane.xlu1 %2106  ;;  %v2113_v39 = vpop.xlane.xlu0 %2112 }
 0xb88   : > { %v2103_v38 = vpop.xlane.xlu1 %2102  ;;  %v2109_v4 = vpop.xlane.xlu0 %2108 }
 0xb89   : > { %3736 = vrcp.f32 %v2103_v38 }
 0xb8a   : > { %3738 = vrcp.f32 %v2109_v4 }
 0xb8b   : > { %v3735_v47 = vpop.eup %3734 }
 0xb8c   : > { %v2111_v37 = vpop.xlane.xlu1 %2110  ;;  %v2115_v7 = vpop.xlane.xlu0 %2114  ;;  %v2148_v2 = vmul.f32 %v3735_v47, %v4916_v0  ;;  %v3508_v47 = vld [vmem:[%s5184_s3] sm:$0xff]  }
 0xb8d   : > { %3740 = vrcp.f32 %v2111_v37 }
 0xb8e   : > { %3742 = vrcp.f32 %v2107_v46 }
 0xb8f   : > { %3744 = vrcp.f32 %v2115_v7 }
 0xb90   : > { %v2121_v12 = vpop.xlane.xlu0 %2120  ;;  %3746 = vrcp.f32 %v2105_v60 }
 0xb91   : > { %3748 = vrcp.f32 %v2113_v39 }
 0xb92   : > { %v2119_v59 = vpop.xlane.xlu1 %2118 }
 0xb93   : > { %v3737_v62 = vpop.eup %3736  ;;  %3750 = vrcp.f32 %v2119_v59 }
 0xb94   : > { %v2117_v28 = vpop.xlane.xlu0 %2116  ;;  %v2149_v53 = vmul.f32 %v3737_v62, %v4929_v29  ;;  %v3739_v19 = vpop.eup %3738 }
 0xb95   : > { %3752 = vrcp.f32 %v2117_v28  ;;  %v2152_v57 = vmul.f32 %v3739_v19, %v4931_v45 }
 0xb96   : > { %v2129_v20 = vpop.xlane.xlu1 %2128  ;;  %v2164_v30 = vpack.c.bf16 %v2149_v53, %v2148_v2 }
 0xb97   : > { %v3741_v43 = vpop.eup %3740 }
 0xb98   : > { %3280 = vmatprep.mubr.bf16.mxu0 %v2164_v30  ;;  %v2123_v18 = vpop.xlane.xlu0 %2122  ;;  %v2153_v40 = vmul.f32 %v3741_v43, %v4938_v13  ;;  %v3743_v55 = vpop.eup %3742 }
 0xb99   : > { %3754 = vrcp.f32 %v2123_v18  ;;  %v3745_v1 = vpop.eup %3744  ;;  %v2151_v23 = vmul.f32 %v3743_v55, %v4920_v58  ;;  %v5215_v55 = vpack.i.bf16 %v4782_v26, %v4776_v24  ;;  %v5218_v24 = vpack.i.bf16 %v4790_v22, %v4786_v5 }
 0xb9a   : > { %3756 = vrcp.f32 %v2121_v12  ;;  %v2125_v50 = vpop.xlane.xlu1 %2124  ;;  %v2166_v32 = vpack.c.bf16 %v2153_v40, %v2152_v57  ;;  %v3747_v0 = vpop.eup %3746  ;;  %v2155_v31 = vmul.f32 %v3745_v1, %v4936_v49  ;;  %v5214_v57 = vpack.i.bf16 %v4778_v42, %v4774_v6 }
 0xb9b   : > { %v3749_v48 = vpop.eup %3748  ;;  %v2150_v45 = vmul.f32 %v3747_v0, %v4911_v41  ;;  %3758 = vrcp.f32 %v2125_v50  ;;  %v5217_v6 = vpack.i.bf16 %v4514_v52, %v4508_v27  ;;  %v5219_v42 = vpack.i.bf16 %v4794_v54, %v4788_v36 }
 0xb9c   : > { %3284 = vmatprep.mubr.bf16.mxu1 %v2166_v32  ;;  %v2154_v13 = vmul.f32 %v3749_v48, %v4922_v8  ;;  %v5216_v48 = vpack.i.bf16 %v4510_v63, %v4506_v61 }
 0xb9d   : > { %v3751_v29 = vpop.eup %3750  ;;  %v2165_v9 = vpack.c.bf16 %v2151_v23, %v2150_v45 }
 0xb9e   : > { %v2187_v35 = vpop.permute.xlu1 %2186  ;;  %v2157_v44 = vmul.f32 %v3751_v29, %v4945_v34  ;;  %v2167_v3 = vpack.c.bf16 %v2155_v31, %v2154_v13 }
 0xb9f   : > { %v3753_v16 = vpop.eup %3752  ;;  %3278 = vmatprep.subr.bf16.mxu0 %v2187_v35  ;;  %3323 = vmatprep.subr.bf16.mxu1 %v2187_v35 }
 0xba0   : > { %3279 = vmatpush3.bf16.msra.mxu0 %v2187_v35  ;;  %3331 = vmatpush3.bf16.msra.mxu1 %v2187_v35  ;;  %v2156_v21 = vmul.f32 %v3753_v16, %v4948_v10 }
 0xba1   : > { %3296 = vmatprep.subr.bf16.mxu1 %v3508_v47 }
 0xba2   : > { %v2168_v25 = vpack.c.bf16 %v2157_v44, %v2156_v21  ;;  %v3393_v52 = vpop.permute.xlu1 %3392 }
 0xba3   : > { %v3755_v58 = vpop.eup %3754  ;;  %3281 = vmatmul.mubr.bf16.vlgmr.msra.gmra.mrb[80].mxu0 %v2165_v9  ;;  %3285 = vmatmul.mubr.bf16.vlgmr.msra.gmra.mrb[48].mxu1 %v2167_v3  ;;  %v3395_v21 = vunpack.i.h.bf16 %v3393_v52  ;;  %v3394_v44 = vunpack.i.l.bf16 %v3393_v52 }
 0xba4   : > { %v3757_v49 = vpop.eup %3756  ;;  %3288 = vmatprep.mubr.bf16.mxu1 %v2168_v25  ;;  %v2159_v41 = vmul.f32 %v3755_v58, %v4954_v51  ;;  %3297 = vmatpush3.bf16.msra.mxu1 %v3508_v47 }
 0xba5   : > { %v2158_v8 = vmul.f32 %v3757_v49, %v4942_v17  ;;  %v3759_v34 = vpop.eup %3758  ;;  %v5220_v49 = vld [vmem:[#allocation4_spill] sm:$0xff] }
 0xba6   : > { %v2160_v39 = vmul.f32 %v3759_v34, %v4957_v33  ;;  %v3509_v33 = vld [vmem:[%s5184_s3 + $0x8] sm:$0xff]   ;;  %v3398_v16 = vpop.permute.xlu1 %3397  ;;  %v5222_v34 = vld [vmem:[#allocation5_spill] sm:$0xff] }
 0xba7   : > { %v2169_v60 = vpack.c.bf16 %v2159_v41, %v2158_v8  ;;  %3298 = vmatprep.subr.bf16.mxu1 %v3509_v33  ;;  %v2488_v41 = vsel %vm473_vm1, %v5220_v49, %v3395_v21  ;;  %v5221_v8 = vld [vmem:[#allocation2_spill] sm:$0xff] }
 0xba8   : > { %3299 = vmatpush3.bf16.msra.mxu1 %v3509_v33 }
 0xbaa   : > { %v3408_v5 = vpop.permute.xlu1 %3407 }
 0xbab   : > { %3289 = vmatmul.mubr.bf16.gmra.mrb[52].mxu1 %v2169_v60  ;;  %v2487_v60 = vsel %vm473_vm1, %v5221_v8, %v3394_v44 }
 0xbae   : > { %v3418_v13 = vpop.permute.xlu1 %3417 }
 0xbb2   : > { %v5058_v3 = vpop.permute.xlu1 %3427 }
 0xbb3   : > { %v3429_v44 = vunpack.i.l.bf16 %v5058_v3 }
 0xbcb   : > { %v2127_v56 = vpop.xlane.xlu0 %2126 }
 0xbcc   : > { %3760 = vrcp.f32 %v2127_v56  ;;  %v3400_v56 = vunpack.i.h.bf16 %v3398_v16 }
 0xbcd   : > { %3762 = vrcp.f32 %v2129_v20 }
 0xbcf   : > { %v2131_v10 = vpop.xlane.xlu0 %2130 }
 0xbd0   : > { %3764 = vrcp.f32 %v2131_v10  ;;  %v3399_v10 = vunpack.i.l.bf16 %v3398_v16 }
 0xbd3   : > { %v3388_v27 = vpop.permute.xlu0 %3387 }
 0xbd4   : > { %v3390_v36 = vunpack.i.h.bf16 %v3388_v27  ;;  %v3389_v54 = vunpack.i.l.bf16 %v3388_v27 }
 0xbd6   : > { %v3761_v46 = vpop.eup %3760 }
 0xbd7   : > { %v2161_v38 = vmul.f32 %v3761_v46, %v4984_v15  ;;  %v3763_v4 = vpop.eup %3762  ;;  %v3403_v35 = vpop.permute.xlu0 %3402  ;;  %v2486_v46 = vsel %vm473_vm1, %v5222_v34, %v3390_v36 }
 0xbd8   : > { %v2162_v17 = vmul.f32 %v3763_v4, %v4951_v14  ;;  %v3405_v25 = vunpack.i.h.bf16 %v3403_v35  ;;  %v3404_v58 = vunpack.i.l.bf16 %v3403_v35 }
 0xbd9   : > { %v2170_v37 = vpack.c.bf16 %v2161_v38, %v2160_v39  ;;  %v5223_v39 = vld [vmem:[#allocation3_spill] sm:$0xff] }
 0xbda   : > { %v3765_v7 = vpop.eup %3764  ;;  %v2485_v38 = vsel %vm473_vm1, %v5223_v39, %v3389_v54  ;;  %v2505_v47 = vsel %vm2501_vm2, %v2488_v41, %v3405_v25  ;;  %v2504_v33 = vsel %vm2501_vm2, %v2487_v60, %v3404_v58  ;;  %v5228_v39 = vld [vmem:[#allocation13_spill] sm:$0xff] }
 0xbdb   : > { %3292 = vmatprep.mubr.bf16.mxu1 %v2170_v37  ;;  %v2163_v51 = vmul.f32 %v3765_v7, %v4987_v11  ;;  %v3413_v45 = vpop.permute.xlu0 %3412  ;;  %v3410_v37 = vunpack.i.h.bf16 %v3408_v5  ;;  %v3409_v7 = vunpack.i.l.bf16 %v3408_v5 }
 0xbdd   : > { %v2171_v12 = vpack.c.bf16 %v2163_v51, %v2162_v17 }
 0xbdf   : > { %3293 = vmatmul.mubr.bf16.gmra.mrb[56].mxu1 %v2171_v12  ;;  %v3423_v22 = vpop.permute.xlu0 %3422 }
 0xbe3   : > { %v5056_v9 = vpop.permute.xlu0 %3432 }
 0xbe4   : > { %v3435_v49 = vunpack.i.h.bf16 %v5056_v9  ;;  %v3434_v41 = vunpack.i.l.bf16 %v5056_v9 }
 0xc76   : > { %v3282_v15 = vpop.f32.mrb[80].mxu0  ;;  %v3286_v59 = vpop.f32.mrb[48].mxu1 }
 0xc77   : > { %v2230_v62 = vpop.f32.mrb[81].mxu0  ;;  %v2246_v14 = vpop.f32.mrb[49].mxu1 }
 0xc78   : > { %v3283_v28 = vpop.f32.mrb[82].mxu0  ;;  %v3287_v11 = vpop.f32.mrb[50].mxu1 }
 0xc79   : > { %v3436_v2 = vpack.i.bf16 %v3283_v28, %v3282_v15  ;;  %v3456_v53 = vpack.i.bf16 %v3287_v11, %v3286_v59  ;;  %v2233_v19 = vpop.f32.mrb[83].mxu0  ;;  %v2249_v20 = vpop.f32.mrb[51].mxu1  ;;  %v2502_v28 = vsel %vm2501_vm2, %v2485_v38, %v3399_v10  ;;  %v2503_v11 = vsel %vm2501_vm2, %v2486_v46, %v3400_v56  ;;  %v5229_v38 = vld [vmem:[#allocation11_spill] sm:$0xff] }
 0xc7a   : > { %v3441_v30 = vpack.i.bf16 %v2233_v19, %v2230_v62  ;;  %v3461_v43 = vpack.i.bf16 %v2249_v20, %v2246_v14 }
 0xc7b   : > { %3437 = vrot.lane.b32.xlu0 %v3436_v2, %s3787_s9  ;;  %v3419_v2 = vunpack.i.l.bf16 %v3418_v13 }
 0xc7c   : > { %3442 = vrot.lane.b32.xlu1 %v3441_v30, %s3787_s9 }
 0xc7e   : > { %v3290_v18 = vpop.f32.mrb[52].mxu1 }
 0xc7f   : > { %3452 = vrot.lane.b32.xlu0 %v5214_v57, %s3786_s20  ;;  %v2262_v40 = vpop.f32.mrb[53].mxu1 }
 0xc80   : > { %3447 = vrot.lane.b32.xlu1 %v5215_v55, %s3786_s20  ;;  %v3291_v1 = vpop.f32.mrb[54].mxu1  ;;  %v3425_v55 = vunpack.i.h.bf16 %v3423_v22 }
 0xc81   : > { %v3476_v50 = vpack.i.bf16 %v3291_v1, %v3290_v18  ;;  %v2265_v32 = vpop.f32.mrb[55].mxu1  ;;  %v3414_v18 = vunpack.i.l.bf16 %v3413_v45  ;;  %v3424_v1 = vunpack.i.l.bf16 %v3423_v22  ;;  %v3430_v22 = vunpack.i.h.bf16 %v5058_v3 }
 0xc82   : > { %v3481_v0 = vpack.i.bf16 %v2265_v32, %v2262_v40 }
 0xc83   : > { %3457 = vrot.lane.b32.xlu0 %v3456_v53, %s3787_s9  ;;  %v2494_v3 = vsel %vm473_vm1, %v5228_v39, %v3430_v22 }
 0xc84   : > { %3462 = vrot.lane.b32.xlu1 %v3461_v43, %s3787_s9  ;;  %v3415_v43 = vunpack.i.h.bf16 %v3413_v45 }
 0xc87   : > { %3472 = vrot.lane.b32.xlu0 %v5216_v48, %s3785_s27  ;;  %v5225_v48 = vld [vmem:[#allocation9_spill] sm:$0xff] }
 0xc88   : > { %3467 = vrot.lane.b32.xlu1 %v5217_v6, %s3785_s27  ;;  %v2490_v6 = vsel %vm473_vm1, %v5225_v48, %v3410_v37 }
 0xc8b   : > { %3477 = vrot.lane.b32.xlu0 %v3476_v50, %s3787_s9  ;;  %v5224_v50 = vld [vmem:[#allocation7_spill] sm:$0xff] }
 0xc8c   : > { %3482 = vrot.lane.b32.xlu1 %v3481_v0, %s3787_s9  ;;  %v2489_v32 = vsel %vm473_vm1, %v5224_v50, %v3409_v7  ;;  %v3420_v0 = vunpack.i.h.bf16 %v3418_v13  ;;  %v5230_v7 = vld [vmem:[#allocation12_spill] sm:$0xff] }
 0xc8d   : > { %v2496_v9 = vsel %vm473_vm1, %v5230_v7, %v3435_v49 }
 0xc8e   : > { %v2507_v5 = vsel %vm2501_vm2, %v2490_v6, %v3420_v0 }
 0xc8f   : > { %3492 = vrot.lane.b32.xlu0 %v5218_v24, %s3786_s20  ;;  %v2506_v24 = vsel %vm2501_vm2, %v2489_v32, %v3419_v2 }
 0xc90   : > { %3487 = vrot.lane.b32.xlu1 %v5219_v42, %s3786_s20 }
 0xcb2   : > { %v3294_v26 = vpop.f32.mrb[56].mxu1 }
 0xcb3   : > { %v2278_v61 = vpop.f32.mrb[57].mxu1 }
 0xcb4   : > { %v3295_v63 = vpop.f32.mrb[58].mxu1 }
 0xcb5   : > { %v3501_v29 = vpack.i.bf16 %v3295_v63, %v3294_v26  ;;  %v2281_v23 = vpop.f32.mrb[59].mxu1  ;;  %v5226_v26 = vld [vmem:[#allocation8_spill] sm:$0xff]  ;;  %v5227_v63 = vld [vmem:[#allocation6_spill] sm:$0xff] }
 0xcb6   : > { %v3496_v31 = vpack.i.bf16 %v2281_v23, %v2278_v61  ;;  %v2492_v61 = vsel %vm473_vm1, %v5226_v26, %v3415_v43  ;;  %v5233_v26 = vld [vmem:[#allocation14_spill] sm:$0xff] }
 0xcb7   : > { %3502 = vrot.lane.b32.xlu0 %v3501_v29, %s3787_s9  ;;  %v2491_v29 = vsel %vm473_vm1, %v5227_v63, %v3414_v18  ;;  %v2509_v35 = vsel %vm2501_vm2, %v2492_v61, %v3425_v55 }
 0xcb8   : > { %3497 = vrot.lane.b32.xlu1 %v3496_v31, %s3787_s9  ;;  %v2508_v52 = vsel %vm2501_vm2, %v2491_v29, %v3424_v1  ;;  %v5234_v29 = vld [vmem:[#allocation17_spill] sm:$0xff] }
 0xced   : > { %v3438_v4 = vpop.permute.xlu0 %3437 }
 0xcee   : > { %v3440_v17 = vunpack.i.h.bf16 %v3438_v4  ;;  %v3439_v51 = vunpack.i.l.bf16 %v3438_v4  ;;  %v3443_v12 = vpop.permute.xlu1 %3442  ;;  %v2493_v4 = vsel %vm473_vm1, %v5229_v38, %v3429_v44 }
 0xcef   : > { %v3445_v15 = vunpack.i.h.bf16 %v3443_v12  ;;  %v3444_v59 = vunpack.i.l.bf16 %v3443_v12 }
 0xcf0   : > { %v2521_v62 = vsel %vm2518_vm3, %v2504_v33, %v3439_v51  ;;  %v2522_v14 = vsel %vm2518_vm3, %v2505_v47, %v3440_v17  ;;  %v5231_v17 = vld [vmem:[#allocation10_spill] sm:$0xff] }
 0xcf1   : > { %v2536_v53 = vpack.c.bf16 %v2522_v14, %v2521_v62  ;;  %v2519_v19 = vsel %vm2518_vm3, %v2502_v28, %v3444_v59  ;;  %v2520_v20 = vsel %vm2518_vm3, %v2503_v11, %v3445_v15  ;;  %v3453_v30 = vpop.permute.xlu0 %3452  ;;  %v2495_v51 = vsel %vm473_vm1, %v5231_v17, %v3434_v41 }
 0xcf2   : > { %v2535_v57 = vpack.c.bf16 %v2520_v20, %v2519_v19  ;;  %v3448_v40 = vpop.permute.xlu1 %3447  ;;  %v3455_v56 = vunpack.i.h.bf16 %v3453_v30  ;;  %v3454_v10 = vunpack.i.l.bf16 %v3453_v30 }
 0xcf3   : > { %v3450_v34 = vunpack.i.h.bf16 %v3448_v40  ;;  %v3449_v46 = vunpack.i.l.bf16 %v3448_v40 }
 0xcf4   : > { %3300 = vmatprep.mubr.msk.bf16.mxu1 %vm303_vm0, %v2535_v57  ;;  %v2512_v15 = vsel %vm2501_vm2, %v2495_v51, %v3454_v10  ;;  %v2513_v59 = vsel %vm2501_vm2, %v2496_v9, %v3455_v56 }
 0xcf5   : > { %v3458_v42 = vpop.permute.xlu0 %3457  ;;  %3301 = vmatmul.mubr.msk.bf16.vlgmr.msra.gmra.mrb[60].mxu1 %vm303_vm0, %v2536_v53  ;;  %v2511_v28 = vsel %vm2501_vm2, %v2494_v3, %v3450_v34  ;;  %v2510_v11 = vsel %vm2501_vm2, %v2493_v4, %v3449_v46 }
 0xcf6   : > { %v3460_v23 = vunpack.i.h.bf16 %v3458_v42  ;;  %v3459_v31 = vunpack.i.l.bf16 %v3458_v42  ;;  %v3463_v27 = vpop.permute.xlu1 %3462 }
 0xcf7   : > { %v3465_v16 = vunpack.i.h.bf16 %v3463_v27  ;;  %v3464_v45 = vunpack.i.l.bf16 %v3463_v27 }
 0xcf8   : > { %v2525_v13 = vsel %vm2518_vm3, %v2508_v52, %v3459_v31  ;;  %v2526_v21 = vsel %vm2518_vm3, %v2509_v35, %v3460_v23  ;;  %v5235_v31 = vld [vmem:[#allocation15_spill] sm:$0xff] }
 0xcf9   : > { %v2538_v36 = vpack.c.bf16 %v2526_v21, %v2525_v13  ;;  %v2524_v54 = vsel %vm2518_vm3, %v2507_v5, %v3465_v16  ;;  %v2523_v25 = vsel %vm2518_vm3, %v2506_v24, %v3464_v45  ;;  %v3473_v58 = vpop.permute.xlu0 %3472  ;;  %v5232_v24 = vld [vmem:[#allocation16_spill] sm:$0xff] }
 0xcfa   : > { %v2537_v8 = vpack.c.bf16 %v2524_v54, %v2523_v25  ;;  %v3468_v60 = vpop.permute.xlu1 %3467  ;;  %v3475_v57 = vunpack.i.h.bf16 %v3473_v58  ;;  %v3474_v40 = vunpack.i.l.bf16 %v3473_v58 }
 0xcfb   : > { %v3470_v1 = vunpack.i.h.bf16 %v3468_v60  ;;  %v3469_v50 = vunpack.i.l.bf16 %v3468_v60 }
 0xcfc   : > { %3304 = vmatprep.mubr.msk.bf16.mxu1 %vm303_vm0, %v2537_v8  ;;  %v2500_v42 = vsel %vm473_vm1, %v5232_v24, %v3475_v57  ;;  %v2499_v61 = vsel %vm473_vm1, %v5233_v26, %v3474_v40  ;;  %v2859_v8 = vld [vmem:[%s5185_s4] ss:$0 sm:$0xff] }
 0xcfd   : > { %v3478_v37 = vpop.permute.xlu0 %3477  ;;  %3305 = vmatmul.mubr.msk.bf16.gmra.mrb[64].mxu1 %vm303_vm0, %v2538_v36  ;;  %v2498_v23 = vsel %vm473_vm1, %v5234_v29, %v3470_v1  ;;  %v2497_v27 = vsel %vm473_vm1, %v5235_v31, %v3469_v50 }
 0xcfe   : > { %v3480_v12 = vunpack.i.h.bf16 %v3478_v37  ;;  %v3479_v47 = vunpack.i.l.bf16 %v3478_v37  ;;  %v3483_v33 = vpop.permute.xlu1 %3482 }
 0xcff   : > { %v3485_v62 = vunpack.i.h.bf16 %v3483_v33  ;;  %v3484_v14 = vunpack.i.l.bf16 %v3483_v33 }
 0xd00   : > { %v2529_v2 = vsel %vm2518_vm3, %v2512_v15, %v3479_v47  ;;  %v2530_v53 = vsel %vm2518_vm3, %v2513_v59, %v3480_v12 }
 0xd01   : > { %v2540_v19 = vpack.c.bf16 %v2530_v53, %v2529_v2  ;;  %v2528_v20 = vsel %vm2518_vm3, %v2511_v28, %v3485_v62  ;;  %v2527_v30 = vsel %vm2518_vm3, %v2510_v11, %v3484_v14  ;;  %v3493_v18 = vpop.permute.xlu0 %3492 }
 0xd02   : > { %v2539_v43 = vpack.c.bf16 %v2528_v20, %v2527_v30  ;;  %v3488_v55 = vpop.permute.xlu1 %3487  ;;  %v3495_v32 = vunpack.i.h.bf16 %v3493_v18  ;;  %v3494_v0 = vunpack.i.l.bf16 %v3493_v18 }
 0xd03   : > { %v3490_v48 = vunpack.i.h.bf16 %v3488_v55  ;;  %v3489_v6 = vunpack.i.l.bf16 %v3488_v55 }
 0xd04   : > { %3308 = vmatprep.mubr.msk.bf16.mxu1 %vm303_vm0, %v2539_v43  ;;  %v2516_v45 = vsel %vm2501_vm2, %v2499_v61, %v3494_v0  ;;  %v2517_v5 = vsel %vm2501_vm2, %v2500_v42, %v3495_v32 }
 0xd05   : > { %3309 = vmatmul.mubr.msk.bf16.gmra.mrb[68].mxu1 %vm303_vm0, %v2540_v19  ;;  %v2515_v21 = vsel %vm2501_vm2, %v2498_v23, %v3490_v48  ;;  %v2514_v44 = vsel %vm2501_vm2, %v2497_v27, %v3489_v6 }
 0xd29   : > { %v3503_v63 = vpop.permute.xlu0 %3502 }
 0xd2a   : > { %v3505_v52 = vunpack.i.h.bf16 %v3503_v63  ;;  %v3504_v35 = vunpack.i.l.bf16 %v3503_v63  ;;  %v3498_v16 = vpop.permute.xlu1 %3497 }
 0xd2b   : > { %v3500_v22 = vunpack.i.h.bf16 %v3498_v16  ;;  %v3499_v13 = vunpack.i.l.bf16 %v3498_v16 }
 0xd2c   : > { %v2533_v36 = vsel %vm2518_vm3, %v2516_v45, %v3504_v35  ;;  %v2534_v54 = vsel %vm2518_vm3, %v2517_v5, %v3505_v52 }
 0xd2d   : > { %v2542_v25 = vpack.c.bf16 %v2534_v54, %v2533_v36  ;;  %v2532_v58 = vsel %vm2518_vm3, %v2515_v21, %v3500_v22  ;;  %v2531_v49 = vsel %vm2518_vm3, %v2514_v44, %v3499_v13 }
 0xd2e   : > { %v2541_v41 = vpack.c.bf16 %v2532_v58, %v2531_v49 }
 0xd30   : > { %3312 = vmatprep.mubr.msk.bf16.mxu1 %vm303_vm0, %v2541_v41 }
 0xd31   : > { %3313 = vmatmul.mubr.msk.bf16.gmra.mrb[72].mxu1 %vm303_vm0, %v2542_v25 }
 0xdc8   : > { %v3302_v60 = vpop.f32.mrb[60].mxu1 }
 0xdc9   : > { %v2633_v56 = vadd.f32 %v3302_v60, %v2859_v8  ;;  %v2624_v10 = vpop.f32.mrb[61].mxu1 }
 0xdca   : > { %v2625_v34 = vadd.f32 %v2859_v8, %v2624_v10  ;;  %v3303_v46 = vpop.f32.mrb[62].mxu1 }
 0xdcb   : > { %2689 = vst.msk [vmem:[%s5144_s15 + $0x10] sm:$0xff] %vm303_vm0, %v2633_v56  ;;  %v2636_v39 = vadd.f32 %v3303_v46, %v2859_v8  ;;  %v2627_v3 = vpop.f32.mrb[63].mxu1 }
 0xdcc   : > { %2687 = vst.msk [vmem:[%s5144_s15] sm:$0xff] %vm303_vm0, %v2625_v34  ;;  %v2628_v38 = vadd.f32 %v2859_v8, %v2627_v3 }
 0xdcd   : > { %2690 = vst.msk [vmem:[%s5144_s15 + $0x18] sm:$0xff] %vm303_vm0, %v2636_v39 }
 0xdce   : > { %2688 = vst.msk [vmem:[%s5144_s15 + $0x8] sm:$0xff] %vm303_vm0, %v2628_v38 }
 0xdd0   : > { %v3306_v4 = vpop.f32.mrb[64].mxu1 }
 0xdd1   : > { %v2649_v37 = vadd.f32 %v3306_v4, %v2859_v8  ;;  %v2640_v7 = vpop.f32.mrb[65].mxu1 }
 0xdd2   : > { %v2641_v9 = vadd.f32 %v2859_v8, %v2640_v7  ;;  %v3307_v17 = vpop.f32.mrb[66].mxu1 }
 0xdd3   : > { %2693 = vst.msk [vmem:[%s5144_s15 + $0x30] sm:$0xff] %vm303_vm0, %v2649_v37  ;;  %v2652_v51 = vadd.f32 %v3307_v17, %v2859_v8  ;;  %v2643_v12 = vpop.f32.mrb[67].mxu1 }
 0xdd4   : > { %2691 = vst.msk [vmem:[%s5144_s15 + $0x20] sm:$0xff] %vm303_vm0, %v2641_v9  ;;  %v2644_v47 = vadd.f32 %v2859_v8, %v2643_v12 }
 0xdd5   : > { %2694 = vst.msk [vmem:[%s5144_s15 + $0x38] sm:$0xff] %vm303_vm0, %v2652_v51 }
 0xdd6   : > { %2692 = vst.msk [vmem:[%s5144_s15 + $0x28] sm:$0xff] %vm303_vm0, %v2644_v47 }
 0xdd8   : > { %v3310_v33 = vpop.f32.mrb[68].mxu1 }
 0xdd9   : > { %v2665_v15 = vadd.f32 %v3310_v33, %v2859_v8  ;;  %v2656_v59 = vpop.f32.mrb[69].mxu1 }
 0xdda   : > { %v2657_v62 = vadd.f32 %v2859_v8, %v2656_v59  ;;  %v3311_v14 = vpop.f32.mrb[70].mxu1 }
 0xddb   : > { %2697 = vst.msk [vmem:[%s5144_s15 + $0x50] sm:$0xff] %vm303_vm0, %v2665_v15  ;;  %v2668_v28 = vadd.f32 %v3311_v14, %v2859_v8  ;;  %v2659_v11 = vpop.f32.mrb[71].mxu1 }
 0xddc   : > { %2695 = vst.msk [vmem:[%s5144_s15 + $0x40] sm:$0xff] %vm303_vm0, %v2657_v62  ;;  %v2660_v2 = vadd.f32 %v2859_v8, %v2659_v11 }
 0xddd   : > { %2698 = vst.msk [vmem:[%s5144_s15 + $0x58] sm:$0xff] %vm303_vm0, %v2668_v28 }
 0xdde   : > { %2696 = vst.msk [vmem:[%s5144_s15 + $0x48] sm:$0xff] %vm303_vm0, %v2660_v2 }
 0xe04   : > { %v3314_v53 = vpop.f32.mrb[72].mxu1 }
 0xe05   : > { %v2681_v19 = vadd.f32 %v3314_v53, %v2859_v8  ;;  %v2672_v20 = vpop.f32.mrb[73].mxu1 }
 0xe06   : > { %v2673_v30 = vadd.f32 %v2859_v8, %v2672_v20  ;;  %v3315_v43 = vpop.f32.mrb[74].mxu1 }
 0xe07   : > { %2701 = vst.msk [vmem:[%s5144_s15 + $0x70] sm:$0xff] %vm303_vm0, %v2681_v19  ;;  %v2684_v18 = vadd.f32 %v3315_v43, %v2859_v8  ;;  %v2675_v57 = vpop.f32.mrb[75].mxu1 }
 0xe08   : > { %2699 = vst.msk [vmem:[%s5144_s15 + $0x60] sm:$0xff] %vm303_vm0, %v2673_v30  ;;  %v2676_v40 = vadd.f32 %v2859_v8, %v2675_v57 }
 0xe09   : > { %2702 = vst.msk [vmem:[%s5144_s15 + $0x78] sm:$0xff] %vm303_vm0, %v2684_v18 }
 0xe0a   : > { %2700 = vst.msk [vmem:[%s5144_s15 + $0x68] sm:$0xff] %vm303_vm0, %v2676_v40 }
 0xe0b PF: > { %s16_s21 = sadd.s32 1, %s3772_s21  }
 0xe0c   : > { %p13_p4 = scmp.ge.s32.totalorder %s16_s21, 6  }
 0xe0e   :  { %15 = sbr.rel (!%p13_p4) target bundleno = 1 (0x1), region = 77 }

</bundles_post_ra>
